<compile_context>
chip_gen: v5e
topology: v5e:2x2
jax: 0.10.0
libtpu: 0.0.40
codegen_flags: <defaults>
</compile_context>

<pallas_src>
import jax
import jax.numpy as jnp
from jax.experimental import pallas as pl
from jax.experimental.pallas import tpu as pltpu


NEG_SLOPE = 0.01  # torch.nn.LeakyReLU default negative_slope

# layer sizes from the PyTorch module
DIMS = [113, 1150, 150, 150, 50, 2]

# lane-aligned padded sizes (zero padding, semantics preserving)
PAD_IN = 128    # 113  -> 128
PAD_H1 = 1152   # 1150 -> 1152


def _leaky_relu(h):
    # keep activation math in f32 (v5e VPU has no bf16 path)
    return jnp.where(h > 0, h, NEG_SLOPE * h)


def mlp_kernel(x_ref,
               w1_ref, b1_ref,
               w2_ref, b2_ref,
               w3_ref, b3_ref,
               w4_ref, b4_ref,
               w5_ref, b5_ref,
               o_ref):
    # x_ref and all w*_ref are bf16; dots accumulate in f32 on the MXU.
    h = jnp.dot(x_ref[...], w1_ref[...],
                preferred_element_type=jnp.float32) + b1_ref[...]
    h = _leaky_relu(h)

    h = jnp.dot(h.astype(jnp.bfloat16), w2_ref[...],
                preferred_element_type=jnp.float32) + b2_ref[...]
    h = _leaky_relu(h)

    h = jnp.dot(h.astype(jnp.bfloat16), w3_ref[...],
                preferred_element_type=jnp.float32) + b3_ref[...]
    h = _leaky_relu(h)

    h = jnp.dot(h.astype(jnp.bfloat16), w4_ref[...],
                preferred_element_type=jnp.float32) + b4_ref[...]
    h = _leaky_relu(h)

    h = jnp.dot(h.astype(jnp.bfloat16), w5_ref[...],
                preferred_element_type=jnp.float32) + b5_ref[...]
    o_ref[...] = h.astype(o_ref.dtype)


def prepare_params(params):
    """Pad (113->128, 1150->1152) and cast weights to bf16; biases stay f32."""
    (w1, b1), (w2, b2), (w3, b3), (w4, b4), (w5, b5) = params

    w1p = jnp.zeros((PAD_IN, PAD_H1), jnp.float32)
    w1p = w1p.at[:w1.shape[0], :w1.shape[1]].set(w1)
    b1p = jnp.zeros((1, PAD_H1), jnp.float32)
    b1p = b1p.at[:, :b1.shape[1]].set(b1)

    w2p = jnp.zeros((PAD_H1, w2.shape[1]), jnp.float32)
    w2p = w2p.at[:w2.shape[0], :].set(w2)

    return [
        (w1p.astype(jnp.bfloat16), b1p),
        (w2p.astype(jnp.bfloat16), b2),
        (w3.astype(jnp.bfloat16), b3),
        (w4.astype(jnp.bfloat16), b4),
        (w5.astype(jnp.bfloat16), b5),
    ]


def ai_calibrate_forward(x, prepared_params):
    """x: (B, 113) float32; prepared_params: output of prepare_params()."""
    B = x.shape[0]

    # Batch tile: fill the MXU M axis (512 rows) at large batch, otherwise a
    # single padded tile (multiple of 8 sublanes).
    if B >= 512:
        TB = 512
    else:
        TB = max(8, ((B + 7) // 8) * 8)
    B_pad = ((B + TB - 1) // TB) * TB

    # pad + cast input on the host (zero rows / zero feature columns)
    xp = jnp.zeros((B_pad, PAD_IN), jnp.float32)
    xp = xp.at[:B, :x.shape[1]].set(x)
    xp = xp.astype(jnp.bfloat16)

    flat_params = []
    for w, b in prepared_params:
        flat_params += [w, b]

    def const_map(i):
        return (0, 0)

    in_specs = [pl.BlockSpec((TB, PAD_IN), lambda i: (i, 0))]
    for w, b in prepared_params:
        in_specs.append(pl.BlockSpec(w.shape, const_map))   # resident weights
        in_specs.append(pl.BlockSpec(b.shape, const_map))   # resident biases

    out_spec = pl.BlockSpec((TB, DIMS[-1]), lambda i: (i, 0))

    # advisory cost estimate for the XLA scheduler
    flops = 2 * B_pad * (PAD_IN * PAD_H1 + PAD_H1 * 150 + 150 * 150
                         + 150 * 50 + 50 * 2)
    bytes_accessed = (xp.size * 2
                      + sum(w.size * 2 + b.size * 4 for w, b in prepared_params)
                      + B_pad * DIMS[-1] * 4)
    cost = pl.CostEstimate(flops=flops, transcendentals=0,
                           bytes_accessed=bytes_accessed)

    out = pl.pallas_call(
        mlp_kernel,
        out_shape=jax.ShapeDtypeStruct((B_pad, DIMS[-1]), jnp.float32),
        grid=(B_pad // TB,),
        in_specs=in_specs,
        out_specs=out_spec,
        compiler_params=pltpu.CompilerParams(
            dimension_semantics=("parallel",)),
        cost_estimate=cost,
    )(xp, *flat_params)

    return out[:B]


def init_params(key):
    """Deterministic PyTorch-style init: U(-1/sqrt(fan_in), +1/sqrt(fan_in))."""
    params = []
    for i in range(len(DIMS) - 1):
        fan_in, fan_out = DIMS[i], DIMS[i + 1]
        key, kw, kb = jax.random.split(key, 3)
        bound = 1.0 / jnp.sqrt(jnp.float32(fan_in))
        w = jax.random.uniform(kw, (fan_in, fan_out), jnp.float32, -bound, bound)
        b = jax.random.uniform(kb, (1, fan_out), jnp.float32, -bound, bound)
        params.append((w, b))
    return params


def reference_forward_f32(x, params):
    """Pure-f32 reference matching the PyTorch module."""
    h = x
    for i, (w, b) in enumerate(params):
        h = h @ w + b
        if i < len(params) - 1:
            h = jnp.where(h > 0, h, NEG_SLOPE * h)
    return h


def reference_forward_bf16(x, prepared_params):
    """Pure-JAX reference that mirrors the kernel's bf16/f32 mixed precision."""
    B = x.shape[0]
    xp = jnp.zeros((B, PAD_IN), jnp.float32).at[:, :x.shape[1]].set(x)
    h = xp.astype(jnp.bfloat16)
    for i, (w, b) in enumerate(prepared_params):
        h = jnp.dot(h.astype(jnp.bfloat16), w,
                    preferred_element_type=jnp.float32) + b
        if i < len(prepared_params) - 1:
            h = jnp.where(h > 0, h, NEG_SLOPE * h)
    return h


if __name__ == "__main__":
    key = jax.random.PRNGKey(0)
    key, kx = jax.random.split(key)

    B = 8
    x = jax.random.normal(kx, (B, DIMS[0]), jnp.float32)
    params = init_params(key)
    prepared = prepare_params(params)

    out = ai_calibrate_forward(x, prepared)
    out = jax.block_until_ready(out)
    assert out.shape == (B, DIMS[-1])

    # exact-semantics check against a pure-JAX reference using the same
    # bf16-operand / f32-accumulate math as the kernel
    ref_bf16 = reference_forward_bf16(x, prepared)
    assert jnp.allclose(out, ref_bf16, atol=1e-3, rtol=1e-3), \
        "mismatch vs bf16-matched reference"

    # loose sanity check against the full-f32 PyTorch-equivalent reference
    ref_f32 = reference_forward_f32(x, params)
    assert jnp.allclose(out, ref_f32, atol=5e-2, rtol=5e-2), \
        "mismatch vs f32 reference"

    print("KERNEL_OK")
</pallas_src>

<mosaic_0001>
module attributes {stable_mosaic.version = 11 : i64} {
  func.func @mlp_kernel(%arg0: i32, %arg1: memref<8x128xbf16, #tpu.memory_space<vmem>>, %arg2: memref<128x1152xbf16, #tpu.memory_space<vmem>>, %arg3: memref<1x1152xf32, #tpu.memory_space<vmem>>, %arg4: memref<1152x150xbf16, #tpu.memory_space<vmem>>, %arg5: memref<1x150xf32, #tpu.memory_space<vmem>>, %arg6: memref<150x150xbf16, #tpu.memory_space<vmem>>, %arg7: memref<1x150xf32, #tpu.memory_space<vmem>>, %arg8: memref<150x50xbf16, #tpu.memory_space<vmem>>, %arg9: memref<1x50xf32, #tpu.memory_space<vmem>>, %arg10: memref<50x2xbf16, #tpu.memory_space<vmem>>, %arg11: memref<1x2xf32, #tpu.memory_space<vmem>>, %arg12: memref<8x2xf32, #tpu.memory_space<vmem>>) attributes {dimension_semantics = [#tpu.dimension_semantics<parallel>], iteration_bounds = array<i64: 1>, scalar_prefetch = 0 : i64, scratch_operands = 0 : i64, tpu.core_type = #tpu.core_type<tc>, window_params = [{transform_indices = @transform_0, window_bounds = array<i64: 8, 128>}, {pipeline_mode = #tpu.pipeline_mode<synchronous>, transform_indices = @transform_1, window_bounds = array<i64: 128, 1152>}, {pipeline_mode = #tpu.pipeline_mode<synchronous>, transform_indices = @transform_2, window_bounds = array<i64: 1, 1152>}, {pipeline_mode = #tpu.pipeline_mode<synchronous>, transform_indices = @transform_3, window_bounds = array<i64: 1152, 150>}, {pipeline_mode = #tpu.pipeline_mode<synchronous>, transform_indices = @transform_4, window_bounds = array<i64: 1, 150>}, {pipeline_mode = #tpu.pipeline_mode<synchronous>, transform_indices = @transform_5, window_bounds = array<i64: 150, 150>}, {pipeline_mode = #tpu.pipeline_mode<synchronous>, transform_indices = @transform_6, window_bounds = array<i64: 1, 150>}, {pipeline_mode = #tpu.pipeline_mode<synchronous>, transform_indices = @transform_7, window_bounds = array<i64: 150, 50>}, {pipeline_mode = #tpu.pipeline_mode<synchronous>, transform_indices = @transform_8, window_bounds = array<i64: 1, 50>}, {pipeline_mode = #tpu.pipeline_mode<synchronous>, transform_indices = @transform_9, window_bounds = array<i64: 50, 2>}, {pipeline_mode = #tpu.pipeline_mode<synchronous>, transform_indices = @transform_10, window_bounds = array<i64: 1, 2>}, {transform_indices = @transform_11, window_bounds = array<i64: 8, 2>}]} {
    %c0 = arith.constant 0 : index
    %c0_0 = arith.constant 0 : index
    %0 = vector.load %arg1[%c0, %c0_0] : memref<8x128xbf16, #tpu.memory_space<vmem>>, vector<8x128xbf16>
    %c0_1 = arith.constant 0 : index
    %c0_2 = arith.constant 0 : index
    %1 = vector.load %arg2[%c0_1, %c0_2] : memref<128x1152xbf16, #tpu.memory_space<vmem>>, vector<128x1152xbf16>
    %cst = arith.constant dense<0.000000e+00> : vector<8x1152xf32>
    %2 = tpu.matmul %0, %1, %cst {dimension_numbers = #tpu.dot_dimension_numbers<[1], [0], [0], [1], [0, 0, 1, 1], [], []>} : vector<8x128xbf16>, vector<128x1152xbf16>, vector<8x1152xf32> -> vector<8x1152xf32>
    %c0_3 = arith.constant 0 : index
    %c0_4 = arith.constant 0 : index
    %3 = vector.load %arg3[%c0_3, %c0_4] : memref<1x1152xf32, #tpu.memory_space<vmem>>, vector<1x1152xf32>
    %4 = vector.broadcast %3 : vector<1x1152xf32> to vector<8x1152xf32>
    %5 = arith.addf %2, %4 : vector<8x1152xf32>
    %cst_5 = arith.constant 0.000000e+00 : f32
    %6 = vector.broadcast %cst_5 : f32 to vector<8x1152xf32>
    %7 = arith.cmpf ogt, %5, %6 : vector<8x1152xf32>
    %cst_6 = arith.constant 0.00999999977 : f32
    %8 = vector.broadcast %cst_6 : f32 to vector<8x1152xf32>
    %9 = arith.mulf %8, %5 : vector<8x1152xf32>
    %10 = arith.select %7, %5, %9 : vector<8x1152xi1>, vector<8x1152xf32>
    %11 = arith.truncf %10 : vector<8x1152xf32> to vector<8x1152xbf16>
    %c0_7 = arith.constant 0 : index
    %c0_8 = arith.constant 0 : index
    %12 = vector.load %arg4[%c0_7, %c0_8] : memref<1152x150xbf16, #tpu.memory_space<vmem>>, vector<1152x150xbf16>
    %cst_9 = arith.constant dense<0.000000e+00> : vector<8x150xf32>
    %13 = tpu.matmul %11, %12, %cst_9 {dimension_numbers = #tpu.dot_dimension_numbers<[1], [0], [0], [1], [0, 0, 1, 1], [], []>} : vector<8x1152xbf16>, vector<1152x150xbf16>, vector<8x150xf32> -> vector<8x150xf32>
    %c0_10 = arith.constant 0 : index
    %c0_11 = arith.constant 0 : index
    %14 = vector.load %arg5[%c0_10, %c0_11] : memref<1x150xf32, #tpu.memory_space<vmem>>, vector<1x150xf32>
    %15 = vector.broadcast %14 : vector<1x150xf32> to vector<8x150xf32>
    %16 = arith.addf %13, %15 : vector<8x150xf32>
    %cst_12 = arith.constant 0.000000e+00 : f32
    %17 = vector.broadcast %cst_12 : f32 to vector<8x150xf32>
    %18 = arith.cmpf ogt, %16, %17 : vector<8x150xf32>
    %cst_13 = arith.constant 0.00999999977 : f32
    %19 = vector.broadcast %cst_13 : f32 to vector<8x150xf32>
    %20 = arith.mulf %19, %16 : vector<8x150xf32>
    %21 = arith.select %18, %16, %20 : vector<8x150xi1>, vector<8x150xf32>
    %22 = arith.truncf %21 : vector<8x150xf32> to vector<8x150xbf16>
    %c0_14 = arith.constant 0 : index
    %c0_15 = arith.constant 0 : index
    %23 = vector.load %arg6[%c0_14, %c0_15] : memref<150x150xbf16, #tpu.memory_space<vmem>>, vector<150x150xbf16>
    %cst_16 = arith.constant dense<0.000000e+00> : vector<8x150xf32>
    %24 = tpu.matmul %22, %23, %cst_16 {dimension_numbers = #tpu.dot_dimension_numbers<[1], [0], [0], [1], [0, 0, 1, 1], [], []>} : vector<8x150xbf16>, vector<150x150xbf16>, vector<8x150xf32> -> vector<8x150xf32>
    %c0_17 = arith.constant 0 : index
    %c0_18 = arith.constant 0 : index
    %25 = vector.load %arg7[%c0_17, %c0_18] : memref<1x150xf32, #tpu.memory_space<vmem>>, vector<1x150xf32>
    %26 = vector.broadcast %25 : vector<1x150xf32> to vector<8x150xf32>
    %27 = arith.addf %24, %26 : vector<8x150xf32>
    %cst_19 = arith.constant 0.000000e+00 : f32
    %28 = vector.broadcast %cst_19 : f32 to vector<8x150xf32>
    %29 = arith.cmpf ogt, %27, %28 : vector<8x150xf32>
    %cst_20 = arith.constant 0.00999999977 : f32
    %30 = vector.broadcast %cst_20 : f32 to vector<8x150xf32>
    %31 = arith.mulf %30, %27 : vector<8x150xf32>
    %32 = arith.select %29, %27, %31 : vector<8x150xi1>, vector<8x150xf32>
    %33 = arith.truncf %32 : vector<8x150xf32> to vector<8x150xbf16>
    %c0_21 = arith.constant 0 : index
    %c0_22 = arith.constant 0 : index
    %34 = vector.load %arg8[%c0_21, %c0_22] : memref<150x50xbf16, #tpu.memory_space<vmem>>, vector<150x50xbf16>
    %cst_23 = arith.constant dense<0.000000e+00> : vector<8x50xf32>
    %35 = tpu.matmul %33, %34, %cst_23 {dimension_numbers = #tpu.dot_dimension_numbers<[1], [0], [0], [1], [0, 0, 1, 1], [], []>} : vector<8x150xbf16>, vector<150x50xbf16>, vector<8x50xf32> -> vector<8x50xf32>
    %c0_24 = arith.constant 0 : index
    %c0_25 = arith.constant 0 : index
    %36 = vector.load %arg9[%c0_24, %c0_25] : memref<1x50xf32, #tpu.memory_space<vmem>>, vector<1x50xf32>
    %37 = vector.broadcast %36 : vector<1x50xf32> to vector<8x50xf32>
    %38 = arith.addf %35, %37 : vector<8x50xf32>
    %cst_26 = arith.constant 0.000000e+00 : f32
    %39 = vector.broadcast %cst_26 : f32 to vector<8x50xf32>
    %40 = arith.cmpf ogt, %38, %39 : vector<8x50xf32>
    %cst_27 = arith.constant 0.00999999977 : f32
    %41 = vector.broadcast %cst_27 : f32 to vector<8x50xf32>
    %42 = arith.mulf %41, %38 : vector<8x50xf32>
    %43 = arith.select %40, %38, %42 : vector<8x50xi1>, vector<8x50xf32>
    %44 = arith.truncf %43 : vector<8x50xf32> to vector<8x50xbf16>
    %c0_28 = arith.constant 0 : index
    %c0_29 = arith.constant 0 : index
    %45 = vector.load %arg10[%c0_28, %c0_29] : memref<50x2xbf16, #tpu.memory_space<vmem>>, vector<50x2xbf16>
    %cst_30 = arith.constant dense<0.000000e+00> : vector<8x2xf32>
    %46 = tpu.matmul %44, %45, %cst_30 {dimension_numbers = #tpu.dot_dimension_numbers<[1], [0], [0], [1], [0, 0, 1, 1], [], []>} : vector<8x50xbf16>, vector<50x2xbf16>, vector<8x2xf32> -> vector<8x2xf32>
    %c0_31 = arith.constant 0 : index
    %c0_32 = arith.constant 0 : index
    %47 = vector.load %arg11[%c0_31, %c0_32] : memref<1x2xf32, #tpu.memory_space<vmem>>, vector<1x2xf32>
    %48 = vector.broadcast %47 : vector<1x2xf32> to vector<8x2xf32>
    %49 = arith.addf %46, %48 : vector<8x2xf32>
    %c0_33 = arith.constant 0 : index
    %c0_34 = arith.constant 0 : index
    %50 = vector.load %arg12[%c0_33, %c0_34] : memref<8x2xf32, #tpu.memory_space<vmem>>, vector<8x2xf32>
    tpu.vector_store %arg12[%c0_33, %c0_34], %49 {strides = array<i32>} : memref<8x2xf32, #tpu.memory_space<vmem>>, vector<8x2xf32>,
    return
  }
  func.func @transform_0(%arg0: i32) -> (i32, i32) {
    %c0_i32 = arith.constant 0 : i32
    %c0_i32_0 = arith.constant 0 : i32
    return %arg0, %c0_i32 : i32, i32
  }
  func.func @transform_1(%arg0: i32) -> (i32, i32) {
    %c0_i32 = arith.constant 0 : i32
    %c0_i32_0 = arith.constant 0 : i32
    %c0_i32_1 = arith.constant 0 : i32
    return %c0_i32, %c0_i32_0 : i32, i32
  }
  func.func @transform_2(%arg0: i32) -> (i32, i32) {
    %c0_i32 = arith.constant 0 : i32
    %c0_i32_0 = arith.constant 0 : i32
    %c0_i32_1 = arith.constant 0 : i32
    return %c0_i32, %c0_i32_0 : i32, i32
  }
  func.func @transform_3(%arg0: i32) -> (i32, i32) {
    %c0_i32 = arith.constant 0 : i32
    %c0_i32_0 = arith.constant 0 : i32
    %c0_i32_1 = arith.constant 0 : i32
    return %c0_i32, %c0_i32_0 : i32, i32
  }
  func.func @transform_4(%arg0: i32) -> (i32, i32) {
    %c0_i32 = arith.constant 0 : i32
    %c0_i32_0 = arith.constant 0 : i32
    %c0_i32_1 = arith.constant 0 : i32
    return %c0_i32, %c0_i32_0 : i32, i32
  }
  func.func @transform_5(%arg0: i32) -> (i32, i32) {
    %c0_i32 = arith.constant 0 : i32
    %c0_i32_0 = arith.constant 0 : i32
    %c0_i32_1 = arith.constant 0 : i32
    return %c0_i32, %c0_i32_0 : i32, i32
  }
  func.func @transform_6(%arg0: i32) -> (i32, i32) {
    %c0_i32 = arith.constant 0 : i32
    %c0_i32_0 = arith.constant 0 : i32
    %c0_i32_1 = arith.constant 0 : i32
    return %c0_i32, %c0_i32_0 : i32, i32
  }
  func.func @transform_7(%arg0: i32) -> (i32, i32) {
    %c0_i32 = arith.constant 0 : i32
    %c0_i32_0 = arith.constant 0 : i32
    %c0_i32_1 = arith.constant 0 : i32
    return %c0_i32, %c0_i32_0 : i32, i32
  }
  func.func @transform_8(%arg0: i32) -> (i32, i32) {
    %c0_i32 = arith.constant 0 : i32
    %c0_i32_0 = arith.constant 0 : i32
    %c0_i32_1 = arith.constant 0 : i32
    return %c0_i32, %c0_i32_0 : i32, i32
  }
  func.func @transform_9(%arg0: i32) -> (i32, i32) {
    %c0_i32 = arith.constant 0 : i32
    %c0_i32_0 = arith.constant 0 : i32
    %c0_i32_1 = arith.constant 0 : i32
    return %c0_i32, %c0_i32_0 : i32, i32
  }
  func.func @transform_10(%arg0: i32) -> (i32, i32) {
    %c0_i32 = arith.constant 0 : i32
    %c0_i32_0 = arith.constant 0 : i32
    %c0_i32_1 = arith.constant 0 : i32
    return %c0_i32, %c0_i32_0 : i32, i32
  }
  func.func @transform_11(%arg0: i32) -> (i32, i32) {
    %c0_i32 = arith.constant 0 : i32
    %c0_i32_0 = arith.constant 0 : i32
    return %arg0, %c0_i32 : i32, i32
  }
}

</mosaic_0001>

<bundles_post_ra>
// kernel: tpu_custom_call.1
= control target key start
LH: loop header
LB: loop body
LE: loop exit
PB: predicated region body
PF: predicated region fallthrough
CT: control target
= control target key end

     0   :  { %vm1899_vm9 = vcmask 1042432   ;;  %vm1895_vm12 = vcmask 179200   ;;  %vm2118_vm13 = vcmask 1040384   ;;  %s4983_s1 = inlined_call_operand.vmem [shape: bf16[128,1152], index: 1, kind: input, shape index: {}]   ;;  %s4984_s0 = inlined_call_operand.vmem [shape: bf16[8,128], index: 0, kind: input, shape index: {}]   ;;  %s4985_s2 = inlined_call_operand.vmem [shape: f32[1,1152], index: 2, kind: input, shape index: {}]   ;;  %s4986_s3 = inlined_call_operand.vmem [shape: bf16[1152,150], index: 3, kind: input, shape index: {}]   ;;  %s4987_s5 = inlined_call_operand.vmem [shape: bf16[150,150], index: 5, kind: input, shape index: {}]   ;;  %s4988_s4 = inlined_call_operand.vmem [shape: f32[1,150], index: 4, kind: input, shape index: {}]   ;;  %s4989_s8 = inlined_call_operand.vmem [shape: f32[1,50], index: 8, kind: input, shape index: {}]   ;;  %s4990_s7 = inlined_call_operand.vmem [shape: bf16[150,50], index: 7, kind: input, shape index: {}]   ;;  %s4991_s9 = inlined_call_operand.vmem [shape: bf16[50,2], index: 9, kind: input, shape index: {}]   ;;  %s4992_s6 = inlined_call_operand.vmem [shape: f32[1,150], index: 6, kind: input, shape index: {}]   ;;  %s4993_s10 = inlined_call_operand.vmem [shape: f32[1,2], index: 10, kind: input, shape index: {}]   ;;  %s4994_s11 = inlined_call_operand.vmem [shape: f32[8,2], index: 11, kind: output, shape index: {}]  }
   0x1   :  { %v2395_v0 = vld [vmem:[%s4983_s1 + $0x1f8] sm:$0xf]  ;;  %v3196_v1 = vld [vmem:[%s4983_s1 + $0x218] sm:$0xf0]  ;;  %v2397_v4 = vld [vmem:[%s4983_s1 + $0x21c] sm:$0xf0] }
   0x2   :  { %v3192_v2 = vld [vmem:[%s4983_s1 + $0x1fc] sm:$0xf]  ;;  %v2396_v3 = vor.u32 %v3196_v1, %v2395_v0  ;;  %v2403_v5 = vld [vmem:[%s4983_s1 + $0x200] sm:$0xf]  ;;  %v3197_v6 = vld [vmem:[%s4983_s1 + $0x220] sm:$0xf0] }
   0x3   :  { %v2400_v7 = vor.u32 %v3192_v2, %v2397_v4  ;;  %v2404_v8 = vor.u32 %v3197_v6, %v2403_v5  ;;  %v3193_v9 = vld [vmem:[%s4983_s1 + $0x204] sm:$0xf]  ;;  %v2405_v10 = vld [vmem:[%s4983_s1 + $0x224] sm:$0xf0]  ;;  %v2359_v11 = vld [vmem:[%s4983_s1 + $0x1b0] sm:$0xf] }
   0x4   :  { %510 = vmatpush.bf16.msra.mxu0 %v2396_v3  ;;  %v2408_v12 = vor.u32 %v3193_v9, %v2405_v10  ;;  %v3187_v13 = vld [vmem:[%s4983_s1 + $0x1d0] sm:$0xf0]  ;;  %v2361_v15 = vld [vmem:[%s4983_s1 + $0x1d4] sm:$0xf0]  ;;  %v3188_v19 = vld [vmem:[%s4983_s1 + $0x1d8] sm:$0xf0] }
   0x5   :  { %v3183_v14 = vld [vmem:[%s4983_s1 + $0x1b4] sm:$0xf]  ;;  %523 = vmatpush.bf16.msra.mxu1 %v2400_v7  ;;  %536 = vmatpush.bf16.msra.mxu2 %v2404_v8  ;;  %v2360_v16 = vor.u32 %v3187_v13, %v2359_v11  ;;  %v2367_v18 = vld [vmem:[%s4983_s1 + $0x1b8] sm:$0xf]  ;;  %v3184_v20 = vld [vmem:[%s4983_s1 + $0x1bc] sm:$0xf] }
   0x6   :  { %v2364_v17 = vor.u32 %v3183_v14, %v2361_v15  ;;  %549 = vmatpush.bf16.msra.mxu3 %v2408_v12  ;;  %v2368_v21 = vor.u32 %v3188_v19, %v2367_v18  ;;  %v2369_v22 = vld [vmem:[%s4983_s1 + $0x1dc] sm:$0xf0]  ;;  %v2323_v23 = vld [vmem:[%s4983_s1 + $0x168] sm:$0xf]  ;;  %v3178_v24 = vld [vmem:[%s4983_s1 + $0x188] sm:$0xf0] }
   0x7   :  { %v2372_v25 = vor.u32 %v3184_v20, %v2369_v22  ;;  %v3174_v26 = vld [vmem:[%s4983_s1 + $0x16c] sm:$0xf]  ;;  %v2325_v27 = vld [vmem:[%s4983_s1 + $0x18c] sm:$0xf0]  ;;  %v2324_v29 = vor.u32 %v3178_v24, %v2323_v23  ;;  %v3179_v30 = vld [vmem:[%s4983_s1 + $0x190] sm:$0xf0] }
   0x8   :  { %v2331_v28 = vld [vmem:[%s4983_s1 + $0x170] sm:$0xf]  ;;  %511 = vmatpush.bf16.msra.mxu0 %v2360_v16  ;;  %v3175_v31 = vld [vmem:[%s4983_s1 + $0x174] sm:$0xf]  ;;  %v2333_v32 = vld [vmem:[%s4983_s1 + $0x194] sm:$0xf0]  ;;  %v2328_v33 = vor.u32 %v3174_v26, %v2325_v27 }
   0x9   :  { %524 = vmatpush.bf16.msra.mxu1 %v2364_v17  ;;  %537 = vmatpush.bf16.msra.mxu2 %v2368_v21  ;;  %v2332_v34 = vor.u32 %v3179_v30, %v2331_v28  ;;  %v2287_v35 = vld [vmem:[%s4983_s1 + $0x120] sm:$0xf]  ;;  %v3169_v36 = vld [vmem:[%s4983_s1 + $0x140] sm:$0xf0]  ;;  %v2336_v38 = vor.u32 %v3175_v31, %v2333_v32  ;;  %v2289_v39 = vld [vmem:[%s4983_s1 + $0x144] sm:$0xf0] }
   0xa   :  { %v3165_v37 = vld [vmem:[%s4983_s1 + $0x124] sm:$0xf]  ;;  %550 = vmatpush.bf16.msra.mxu3 %v2372_v25  ;;  %v2295_v40 = vld [vmem:[%s4983_s1 + $0x128] sm:$0xf]  ;;  %v3170_v41 = vld [vmem:[%s4983_s1 + $0x148] sm:$0xf0]  ;;  %v2288_v44 = vor.u32 %v3169_v36, %v2287_v35 }
   0xb   :  { %v3166_v42 = vld [vmem:[%s4983_s1 + $0x12c] sm:$0xf]  ;;  %v2297_v43 = vld [vmem:[%s4983_s1 + $0x14c] sm:$0xf0]  ;;  %v2292_v45 = vor.u32 %v3165_v37, %v2289_v39  ;;  %v2296_v46 = vor.u32 %v3170_v41, %v2295_v40  ;;  %v2251_v47 = vld [vmem:[%s4983_s1 + $0xd8] sm:$0xf] }
   0xc   :  { %512 = vmatpush.bf16.msra.mxu0 %v2324_v29  ;;  %v3160_v48 = vld [vmem:[%s4983_s1 + $0xf8] sm:$0xf0]  ;;  %v2300_v50 = vor.u32 %v3166_v42, %v2297_v43  ;;  %v2253_v51 = vld [vmem:[%s4983_s1 + $0xfc] sm:$0xf0]  ;;  %v3161_v53 = vld [vmem:[%s4983_s1 + $0x100] sm:$0xf0] }
   0xd   :  { %525 = vmatpush.bf16.msra.mxu1 %v2328_v33  ;;  %538 = vmatpush.bf16.msra.mxu2 %v2332_v34  ;;  %v3156_v49 = vld [vmem:[%s4983_s1 + $0xdc] sm:$0xf]  ;;  %v2259_v52 = vld [vmem:[%s4983_s1 + $0xe0] sm:$0xf]  ;;  %v3157_v54 = vld [vmem:[%s4983_s1 + $0xe4] sm:$0xf]  ;;  %v2252_v56 = vor.u32 %v3160_v48, %v2251_v47 }
   0xe   :  { %551 = vmatpush.bf16.msra.mxu3 %v2336_v38  ;;  %v2261_v55 = vld [vmem:[%s4983_s1 + $0x104] sm:$0xf0]  ;;  %v2256_v57 = vor.u32 %v3156_v49, %v2253_v51  ;;  %v2260_v58 = vor.u32 %v3161_v53, %v2259_v52  ;;  %v2215_v59 = vld [vmem:[%s4983_s1 + $0x90] sm:$0xf]  ;;  %v3151_v60 = vld [vmem:[%s4983_s1 + $0xb0] sm:$0xf0] }
   0xf   :  { %v3147_v61 = vld [vmem:[%s4983_s1 + $0x94] sm:$0xf]  ;;  %v2264_v62 = vor.u32 %v3157_v54, %v2261_v55  ;;  %v2217_v63 = vld [vmem:[%s4983_s1 + $0xb4] sm:$0xf0]  ;;  %v3152_v1 = vld [vmem:[%s4983_s1 + $0xb8] sm:$0xf0]  ;;  %v2216_v4 = vor.u32 %v3151_v60, %v2215_v59 }
  0x10   :  { %513 = vmatpush.bf16.msra.mxu0 %v2288_v44  ;;  %v2223_v0 = vld [vmem:[%s4983_s1 + $0x98] sm:$0xf]  ;;  %v3148_v2 = vld [vmem:[%s4983_s1 + $0x9c] sm:$0xf]  ;;  %v2225_v3 = vld [vmem:[%s4983_s1 + $0xbc] sm:$0xf0]  ;;  %v2220_v5 = vor.u32 %v3147_v61, %v2217_v63 }
  0x11   :  { %526 = vmatpush.bf16.msra.mxu1 %v2292_v45  ;;  %539 = vmatpush.bf16.msra.mxu2 %v2296_v46  ;;  %v2224_v6 = vor.u32 %v3152_v1, %v2223_v0  ;;  %v2179_v7 = vld [vmem:[%s4983_s1 + $0x48] sm:$0xf]  ;;  %v3142_v8 = vld [vmem:[%s4983_s1 + $0x68] sm:$0xf0]  ;;  %v2228_v10 = vor.u32 %v3148_v2, %v2225_v3  ;;  %v2181_v11 = vld [vmem:[%s4983_s1 + $0x6c] sm:$0xf0] }
  0x12   :  { %552 = vmatpush.bf16.msra.mxu3 %v2300_v50  ;;  %v3138_v9 = vld [vmem:[%s4983_s1 + $0x4c] sm:$0xf]  ;;  %v2187_v12 = vld [vmem:[%s4983_s1 + $0x50] sm:$0xf]  ;;  %v3143_v13 = vld [vmem:[%s4983_s1 + $0x70] sm:$0xf0]  ;;  %v2180_v16 = vor.u32 %v3142_v8, %v2179_v7 }
  0x13   :  { %v3139_v14 = vld [vmem:[%s4983_s1 + $0x54] sm:$0xf]  ;;  %v2189_v15 = vld [vmem:[%s4983_s1 + $0x74] sm:$0xf0]  ;;  %v2143_v17 = vld [vmem:[%s4983_s1] sm:$0xf]  ;;  %v2184_v19 = vor.u32 %v3138_v9, %v2181_v11  ;;  %v2188_v20 = vor.u32 %v3143_v13, %v2187_v12 }
  0x14   :  { %514 = vmatpush.bf16.msra.mxu0 %v2252_v56  ;;  %v3133_v18 = vld [vmem:[%s4983_s1 + $0x20] sm:$0xf0]  ;;  %v2145_v22 = vld [vmem:[%s4983_s1 + $0x24] sm:$0xf0]  ;;  %v2192_v24 = vor.u32 %v3139_v14, %v2189_v15  ;;  %v3134_v25 = vld [vmem:[%s4983_s1 + $0x28] sm:$0xf0] }
  0x15   :  { %527 = vmatpush.bf16.msra.mxu1 %v2256_v57  ;;  %540 = vmatpush.bf16.msra.mxu2 %v2260_v58  ;;  %v3129_v21 = vld [vmem:[%s4983_s1 + $0x4] sm:$0xf]  ;;  %v2151_v23 = vld [vmem:[%s4983_s1 + $0x8] sm:$0xf]  ;;  %v3130_v26 = vld [vmem:[%s4983_s1 + $0xc] sm:$0xf]  ;;  %v2144_v31 = vor.u32 %v3133_v18, %v2143_v17 }
  0x16   :  { %553 = vmatpush.bf16.msra.mxu3 %v2264_v62  ;;  %v2153_v27 = vld [vmem:[%s4983_s1 + $0x2c] sm:$0xf0]  ;;  %v2411_v28 = vld [vmem:[%s4983_s1 + $0x208] sm:$0xf]  ;;  %v3198_v29 = vld [vmem:[%s4983_s1 + $0x228] sm:$0xf0]  ;;  %v2148_v35 = vor.u32 %v3129_v21, %v2145_v22  ;;  %v2152_v36 = vor.u32 %v3134_v25, %v2151_v23 }
  0x17   :  { %v3194_v30 = vld [vmem:[%s4983_s1 + $0x20c] sm:$0xf]  ;;  %v2413_v32 = vld [vmem:[%s4983_s1 + $0x22c] sm:$0xf0]  ;;  %v3199_v34 = vld [vmem:[%s4983_s1 + $0x230] sm:$0xf0]  ;;  %v2156_v39 = vor.u32 %v3130_v26, %v2153_v27  ;;  %v2412_v40 = vor.u32 %v3198_v29, %v2411_v28 }
  0x18   :  { %515 = vmatpush.bf16.msra.mxu0 %v2216_v4  ;;  %v2419_v33 = vld [vmem:[%s4983_s1 + $0x210] sm:$0xf]  ;;  %v3195_v37 = vld [vmem:[%s4983_s1 + $0x214] sm:$0xf]  ;;  %v2421_v38 = vld [vmem:[%s4983_s1 + $0x234] sm:$0xf0]  ;;  %v2416_v41 = vor.u32 %v3194_v30, %v2413_v32 }
  0x19   :  { %528 = vmatpush.bf16.msra.mxu1 %v2220_v5  ;;  %541 = vmatpush.bf16.msra.mxu2 %v2224_v6  ;;  %v2420_v42 = vor.u32 %v3199_v34, %v2419_v33  ;;  %v2375_v43 = vld [vmem:[%s4983_s1 + $0x1c0] sm:$0xf]  ;;  %v3189_v44 = vld [vmem:[%s4983_s1 + $0x1e0] sm:$0xf0]  ;;  %v2424_v46 = vor.u32 %v3195_v37, %v2421_v38  ;;  %v2377_v47 = vld [vmem:[%s4983_s1 + $0x1e4] sm:$0xf0] }
  0x1a   :  { %554 = vmatpush.bf16.msra.mxu3 %v2228_v10  ;;  %v3185_v45 = vld [vmem:[%s4983_s1 + $0x1c4] sm:$0xf]  ;;  %v2383_v48 = vld [vmem:[%s4983_s1 + $0x1c8] sm:$0xf]  ;;  %v3190_v49 = vld [vmem:[%s4983_s1 + $0x1e8] sm:$0xf0]  ;;  %v2376_v53 = vor.u32 %v3189_v44, %v2375_v43 }
  0x1b   :  { %v3675_v50 = vld [vmem:[%s4984_s0] sm:$0xf]  ;;  %v3186_v51 = vld [vmem:[%s4983_s1 + $0x1cc] sm:$0xf]  ;;  %v2385_v52 = vld [vmem:[%s4983_s1 + $0x1ec] sm:$0xf0]  ;;  %v2380_v54 = vor.u32 %v3185_v45, %v2377_v47  ;;  %v2384_v55 = vor.u32 %v3190_v49, %v2383_v48 }
  0x1c   :  { %516 = vmatpush.bf16.msra.mxu0 %v2180_v16  ;;  %v2339_v56 = vld [vmem:[%s4983_s1 + $0x178] sm:$0xf]  ;;  %v3180_v57 = vld [vmem:[%s4983_s1 + $0x198] sm:$0xf0]  ;;  %v2388_v59 = vor.u32 %v3186_v51, %v2385_v52  ;;  %v2341_v60 = vld [vmem:[%s4983_s1 + $0x19c] sm:$0xf0] }
  0x1d   :  { %529 = vmatpush.bf16.msra.mxu1 %v2184_v19  ;;  %542 = vmatpush.bf16.msra.mxu2 %v2188_v20  ;;  %v3176_v58 = vld [vmem:[%s4983_s1 + $0x17c] sm:$0xf]  ;;  %v2347_v61 = vld [vmem:[%s4983_s1 + $0x180] sm:$0xf]  ;;  %v3181_v62 = vld [vmem:[%s4983_s1 + $0x1a0] sm:$0xf0]  ;;  %v2340_v1 = vor.u32 %v3180_v57, %v2339_v56 }
  0x1e   :  { %555 = vmatpush.bf16.msra.mxu3 %v2192_v24  ;;  %v3177_v63 = vld [vmem:[%s4983_s1 + $0x184] sm:$0xf]  ;;  %v2349_v0 = vld [vmem:[%s4983_s1 + $0x1a4] sm:$0xf0]  ;;  %v2344_v2 = vor.u32 %v3176_v58, %v2341_v60  ;;  %v2348_v3 = vor.u32 %v3181_v62, %v2347_v61  ;;  %v2303_v4 = vld [vmem:[%s4983_s1 + $0x130] sm:$0xf] }
  0x1f   :  { %v3171_v5 = vld [vmem:[%s4983_s1 + $0x150] sm:$0xf0]  ;;  %v2352_v7 = vor.u32 %v3177_v63, %v2349_v0  ;;  %v2305_v8 = vld [vmem:[%s4983_s1 + $0x154] sm:$0xf0]  ;;  %v3172_v10 = vld [vmem:[%s4983_s1 + $0x158] sm:$0xf0] }
  0x20   :  { %517 = vmatpush.bf16.msra.mxu0 %v2144_v31  ;;  %v3167_v6 = vld [vmem:[%s4983_s1 + $0x134] sm:$0xf]  ;;  %v2311_v9 = vld [vmem:[%s4983_s1 + $0x138] sm:$0xf]  ;;  %v3168_v11 = vld [vmem:[%s4983_s1 + $0x13c] sm:$0xf]  ;;  %v2304_v13 = vor.u32 %v3171_v5, %v2303_v4 }
  0x21   :  { %530 = vmatpush.bf16.msra.mxu1 %v2148_v35  ;;  %543 = vmatpush.bf16.msra.mxu2 %v2152_v36  ;;  %v2313_v12 = vld [vmem:[%s4983_s1 + $0x15c] sm:$0xf0]  ;;  %v2308_v14 = vor.u32 %v3167_v6, %v2305_v8  ;;  %v2312_v15 = vor.u32 %v3172_v10, %v2311_v9  ;;  %v2267_v16 = vld [vmem:[%s4983_s1 + $0xe8] sm:$0xf]  ;;  %v3162_v17 = vld [vmem:[%s4983_s1 + $0x108] sm:$0xf0] }
  0x22   :  { %556 = vmatpush.bf16.msra.mxu3 %v2156_v39  ;;  %v3158_v18 = vld [vmem:[%s4983_s1 + $0xec] sm:$0xf]  ;;  %v2316_v19 = vor.u32 %v3168_v11, %v2313_v12  ;;  %v2269_v20 = vld [vmem:[%s4983_s1 + $0x10c] sm:$0xf0]  ;;  %v3163_v22 = vld [vmem:[%s4983_s1 + $0x110] sm:$0xf0]  ;;  %v2268_v25 = vor.u32 %v3162_v17, %v2267_v16 }
  0x23   :  { %518 = vmatmul.bf16.vlgmr.msra.gmra.mxu0 %v3675_v50  ;;  %v2275_v21 = vld [vmem:[%s4983_s1 + $0xf0] sm:$0xf]  ;;  %v3159_v23 = vld [vmem:[%s4983_s1 + $0xf4] sm:$0xf]  ;;  %v2277_v24 = vld [vmem:[%s4983_s1 + $0x114] sm:$0xf0]  ;;  %v2272_v27 = vor.u32 %v3158_v18, %v2269_v20 }
  0x24   :  { %562 = vmatpush.bf16.msrb.mxu0 %v2412_v40  ;;  %531 = vmatmul.bf16.vlgmr.msra.gmra.mxu1 %v3675_v50  ;;  %v2231_v26 = vld [vmem:[%s4983_s1 + $0xa0] sm:$0xf]  ;;  %v2276_v28 = vor.u32 %v3163_v22, %v2275_v21  ;;  %v3153_v29 = vld [vmem:[%s4983_s1 + $0xc0] sm:$0xf0]  ;;  %v2280_v31 = vor.u32 %v3159_v23, %v2277_v24  ;;  %v2233_v32 = vld [vmem:[%s4983_s1 + $0xc4] sm:$0xf0] }
  0x25   :  { %575 = vmatpush.bf16.msrb.mxu1 %v2416_v41  ;;  %588 = vmatpush.bf16.msrb.mxu2 %v2420_v42  ;;  %v3149_v30 = vld [vmem:[%s4983_s1 + $0xa4] sm:$0xf]  ;;  %v2239_v33 = vld [vmem:[%s4983_s1 + $0xa8] sm:$0xf]  ;;  %v3154_v34 = vld [vmem:[%s4983_s1 + $0xc8] sm:$0xf0]  ;;  %v2232_v37 = vor.u32 %v3153_v29, %v2231_v26 }
  0x26   :  { %601 = vmatpush.bf16.msrb.mxu3 %v2424_v46  ;;  %544 = vmatmul.bf16.vlgmr.msra.gmra.mxu2 %v3675_v50  ;;  %v3150_v35 = vld [vmem:[%s4983_s1 + $0xac] sm:$0xf]  ;;  %v2241_v36 = vld [vmem:[%s4983_s1 + $0xcc] sm:$0xf0]  ;;  %v2236_v38 = vor.u32 %v3149_v30, %v2233_v32  ;;  %v2240_v39 = vor.u32 %v3154_v34, %v2239_v33  ;;  %v2195_v40 = vld [vmem:[%s4983_s1 + $0x58] sm:$0xf] }
  0x27   :  { %557 = vmatmul.bf16.vlgmr.msra.gmra.mxu3 %v3675_v50  ;;  %v3144_v41 = vld [vmem:[%s4983_s1 + $0x78] sm:$0xf0]  ;;  %v2244_v43 = vor.u32 %v3150_v35, %v2241_v36  ;;  %v2197_v44 = vld [vmem:[%s4983_s1 + $0x7c] sm:$0xf0]  ;;  %v3145_v46 = vld [vmem:[%s4983_s1 + $0x80] sm:$0xf0] }
  0x28   :  { %563 = vmatpush.bf16.msrb.mxu0 %v2376_v53  ;;  %v3140_v42 = vld [vmem:[%s4983_s1 + $0x5c] sm:$0xf]  ;;  %v2203_v45 = vld [vmem:[%s4983_s1 + $0x60] sm:$0xf]  ;;  %v3141_v47 = vld [vmem:[%s4983_s1 + $0x64] sm:$0xf]  ;;  %v2196_v49 = vor.u32 %v3144_v41, %v2195_v40 }
  0x29   :  { %576 = vmatpush.bf16.msrb.mxu1 %v2380_v54  ;;  %589 = vmatpush.bf16.msrb.mxu2 %v2384_v55  ;;  %v2205_v48 = vld [vmem:[%s4983_s1 + $0x84] sm:$0xf0]  ;;  %v2159_v51 = vld [vmem:[%s4983_s1 + $0x10] sm:$0xf]  ;;  %v2200_v52 = vor.u32 %v3140_v42, %v2197_v44  ;;  %v2204_v53 = vor.u32 %v3145_v46, %v2203_v45  ;;  %v3135_v54 = vld [vmem:[%s4983_s1 + $0x30] sm:$0xf0] }
  0x2a   :  { %602 = vmatpush.bf16.msrb.mxu3 %v2388_v59  ;;  %v3131_v55 = vld [vmem:[%s4983_s1 + $0x14] sm:$0xf]  ;;  %v2161_v56 = vld [vmem:[%s4983_s1 + $0x34] sm:$0xf0]  ;;  %v2208_v57 = vor.u32 %v3141_v47, %v2205_v48  ;;  %v3136_v59 = vld [vmem:[%s4983_s1 + $0x38] sm:$0xf0]  ;;  %v2160_v0 = vor.u32 %v3135_v54, %v2159_v51 }
  0x2b   :  { %v2167_v58 = vld [vmem:[%s4983_s1 + $0x18] sm:$0xf]  ;;  %v3132_v60 = vld [vmem:[%s4983_s1 + $0x1c] sm:$0xf]  ;;  %v2169_v61 = vld [vmem:[%s4983_s1 + $0x3c] sm:$0xf0] }
  0x2c   :  { %564 = vmatpush.bf16.msrb.mxu0 %v2340_v1  ;;  %v2427_v62 = vld [vmem:[%s4983_s1 + $0x218] sm:$0xf]  ;;  %v3200_v63 = vld [vmem:[%s4983_s1 + $0x238] sm:$0xf0]  ;;  %v2164_v1 = vor.u32 %v3131_v55, %v2161_v56  ;;  %v2391_v5 = vld [vmem:[%s4983_s1 + $0x1d0] sm:$0xf] }
  0x2d   :  { %577 = vmatpush.bf16.msrb.mxu1 %v2344_v2  ;;  %590 = vmatpush.bf16.msrb.mxu2 %v2348_v3  ;;  %v2168_v2 = vor.u32 %v3136_v59, %v2167_v58  ;;  %v2172_v3 = vor.u32 %v3132_v60, %v2169_v61  ;;  %v2428_v4 = vor.u32 %v3200_v63, %v2427_v62  ;;  %v3191_v6 = vld [vmem:[%s4983_s1 + $0x1f0] sm:$0xf0]  ;;  %v3182_v8 = vld [vmem:[%s4983_s1 + $0x1a8] sm:$0xf0]  ;;  %v2551_v9 = vld [vmem:[%s4986_s3 + $0xf0] sm:$0xf] }
  0x2e   :  { %603 = vmatpush.bf16.msrb.mxu3 %v2352_v7  ;;  %v2355_v7 = vld [vmem:[%s4983_s1 + $0x188] sm:$0xf]  ;;  %v3232_v10 = vld [vmem:[%s4986_s3 + $0xf4] sm:$0xf0]  ;;  %v2487_v11 = vld [vmem:[%s4986_s3 + $0x70] sm:$0xf]  ;;  %v2392_v12 = vor.u32 %v3191_v6, %v2391_v5 }
  0x2f   :  { %v3230_v16 = vld [vmem:[%s4986_s3 + $0xe4] sm:$0xf0]  ;;  %v2479_v18 = vld [vmem:[%s4986_s3 + $0x60] sm:$0xf]  ;;  %v2615_v20 = vld [vmem:[%s4986_s3 + $0x170] sm:$0xf]  ;;  %v2356_v26 = vor.u32 %v3182_v8, %v2355_v7 }
  0x30   :  { %565 = vmatpush.bf16.msrb.mxu0 %v2304_v13  ;;  %v2552_v13 = vor.u32 %v3232_v10, %v2551_v9  ;;  %v3248_v21 = vld [vmem:[%s4986_s3 + $0x174] sm:$0xf0]  ;;  %v2319_v22 = vld [vmem:[%s4983_s1 + $0x140] sm:$0xf]  ;;  %v3246_v30 = vld [vmem:[%s4986_s3 + $0x164] sm:$0xf0] }
  0x31   :  { %578 = vmatpush.bf16.msrb.mxu1 %v2308_v14  ;;  %591 = vmatpush.bf16.msrb.mxu2 %v2312_v15  ;;  %v3216_v14 = vld [vmem:[%s4986_s3 + $0x74] sm:$0xf0]  ;;  %v2543_v15 = vld [vmem:[%s4986_s3 + $0xe0] sm:$0xf]  ;;  %v2616_v24 = vor.u32 %v3248_v21, %v2615_v20  ;;  %v2471_v32 = vld [vmem:[%s4986_s3 + $0x50] sm:$0xf] }
  0x32   :  { %604 = vmatpush.bf16.msrb.mxu3 %v2316_v19  ;;  %v2488_v17 = vor.u32 %v3216_v14, %v2487_v11  ;;  %v3214_v19 = vld [vmem:[%s4986_s3 + $0x64] sm:$0xf0]  ;;  %v2544_v23 = vor.u32 %v3230_v16, %v2543_v15  ;;  %v2607_v29 = vld [vmem:[%s4986_s3 + $0x160] sm:$0xf]  ;;  %v3212_v33 = vld [vmem:[%s4986_s3 + $0x54] sm:$0xf0] }
  0x33   :  { %v2608_v34 = vor.u32 %v3246_v30, %v2607_v29  ;;  %v2599_v36 = vld [vmem:[%s4986_s3 + $0x150] sm:$0xf]  ;;  %v2472_v40 = vor.u32 %v3212_v33, %v2471_v32  ;;  %v2527_v41 = vld [vmem:[%s4986_s3 + $0xc0] sm:$0xf]  ;;  %v3226_v42 = vld [vmem:[%s4986_s3 + $0xc4] sm:$0xf0] }
  0x34   :  { %566 = vmatpush.bf16.msrb.mxu0 %v2268_v25  ;;  %v2535_v25 = vld [vmem:[%s4986_s3 + $0xd0] sm:$0xf]  ;;  %v2463_v44 = vld [vmem:[%s4986_s3 + $0x40] sm:$0xf]  ;;  %v3210_v45 = vld [vmem:[%s4986_s3 + $0x44] sm:$0xf0] }
  0x35   :  { %579 = vmatpush.bf16.msrb.mxu1 %v2272_v27  ;;  %592 = vmatpush.bf16.msrb.mxu2 %v2276_v28  ;;  %v2480_v27 = vor.u32 %v3214_v19, %v2479_v18  ;;  %v3228_v28 = vld [vmem:[%s4986_s3 + $0xd4] sm:$0xf0]  ;;  %v2591_v47 = vld [vmem:[%s4986_s3 + $0x140] sm:$0xf]  ;;  %v3242_v48 = vld [vmem:[%s4986_s3 + $0x144] sm:$0xf0] }
  0x36   :  { %605 = vmatpush.bf16.msrb.mxu3 %v2280_v31  ;;  %v3173_v31 = vld [vmem:[%s4983_s1 + $0x160] sm:$0xf0]  ;;  %v2536_v35 = vor.u32 %v3228_v28, %v2535_v25  ;;  %v2519_v54 = vld [vmem:[%s4986_s3 + $0xb0] sm:$0xf]  ;;  %v3224_v55 = vld [vmem:[%s4986_s3 + $0xb4] sm:$0xf0]  ;;  %v2592_v59 = vor.u32 %v3242_v48, %v2591_v47 }
  0x37   :  { %v3155_v56 = vld [vmem:[%s4983_s1 + $0xd0] sm:$0xf0]  ;;  %v3208_v58 = vld [vmem:[%s4986_s3 + $0x34] sm:$0xf0]  ;;  %v2583_v60 = vld [vmem:[%s4986_s3 + $0x130] sm:$0xf]  ;;  %v2520_v62 = vor.u32 %v3224_v55, %v2519_v54 }
  0x38   :  { %567 = vmatpush.bf16.msrb.mxu0 %v2232_v37  ;;  %v3244_v37 = vld [vmem:[%s4986_s3 + $0x154] sm:$0xf0]  ;;  %v2447_v5 = vld [vmem:[%s4986_s3 + $0x20] sm:$0xf]  ;;  %v3206_v6 = vld [vmem:[%s4986_s3 + $0x24] sm:$0xf0] }
  0x39   :  { %580 = vmatpush.bf16.msrb.mxu1 %v2236_v38  ;;  %593 = vmatpush.bf16.msrb.mxu2 %v2240_v39  ;;  %v2320_v38 = vor.u32 %v3173_v31, %v2319_v22  ;;  %v2283_v39 = vld [vmem:[%s4983_s1 + $0xf8] sm:$0xf]  ;;  %v2600_v46 = vor.u32 %v3244_v37, %v2599_v36  ;;  %v2575_v8 = vld [vmem:[%s4986_s3 + $0x120] sm:$0xf]  ;;  %v3238_v9 = vld [vmem:[%s4986_s3 + $0x124] sm:$0xf0]  ;;  %v2448_v14 = vor.u32 %v3206_v6, %v2447_v5 }
  0x3a   :  { %606 = vmatpush.bf16.msrb.mxu3 %v2244_v43  ;;  %v3164_v43 = vld [vmem:[%s4983_s1 + $0x118] sm:$0xf0]  ;;  %v3240_v61 = vld [vmem:[%s4986_s3 + $0x134] sm:$0xf0]  ;;  %v2175_v10 = vld [vmem:[%s4983_s1 + $0x20] sm:$0xf]  ;;  %v2576_v20 = vor.u32 %v3238_v9, %v2575_v8 }
  0x3b   :  { %v2284_v51 = vor.u32 %v3164_v43, %v2283_v39  ;;  %v2584_v7 = vor.u32 %v3240_v61, %v2583_v60  ;;  %v2503_v15 = vld [vmem:[%s4986_s3 + $0x90] sm:$0xf]  ;;  %v3220_v16 = vld [vmem:[%s4986_s3 + $0x94] sm:$0xf0]  ;;  %v2495_v28 = vld [vmem:[%s4986_s3 + $0x80] sm:$0xf] }
  0x3c   :  { %568 = vmatpush.bf16.msrb.mxu0 %v2196_v49  ;;  %v2528_v49 = vor.u32 %v3226_v42, %v2527_v41  ;;  %v2439_v18 = vld [vmem:[%s4986_s3 + $0x10] sm:$0xf]  ;;  %v3204_v19 = vld [vmem:[%s4986_s3 + $0x14] sm:$0xf0]  ;;  %v3218_v29 = vld [vmem:[%s4986_s3 + $0x84] sm:$0xf0] }
  0x3d   :  { %581 = vmatpush.bf16.msrb.mxu1 %v2200_v52  ;;  %594 = vmatpush.bf16.msrb.mxu2 %v2204_v53  ;;  %v2247_v52 = vld [vmem:[%s4983_s1 + $0xb0] sm:$0xf]  ;;  %v2464_v53 = vor.u32 %v3210_v45, %v2463_v44  ;;  %v3264_v21 = vld [vmem:[%s4986_s3 + $0x1f4] sm:$0xf0]  ;;  %v2431_v30 = vld [vmem:[%s4986_s3] sm:$0xf]  ;;  %v2496_v39 = vor.u32 %v3218_v29, %v2495_v28 }
  0x3e   :  { %607 = vmatpush.bf16.msrb.mxu3 %v2208_v57  ;;  %v2455_v57 = vld [vmem:[%s4986_s3 + $0x30] sm:$0xf]  ;;  %v2248_v63 = vor.u32 %v3155_v56, %v2247_v52  ;;  %v3202_v32 = vld [vmem:[%s4986_s3 + $0x4] sm:$0xf0]  ;;  %v3312_v45 = vld [vmem:[%s4986_s3 + $0x374] sm:$0xf0] }
  0x3f   :  { %v2567_v22 = vld [vmem:[%s4986_s3 + $0x110] sm:$0xf]  ;;  %v3262_v36 = vld [vmem:[%s4986_s3 + $0x1e4] sm:$0xf0]  ;;  %v2432_v42 = vor.u32 %v3202_v32, %v2431_v30  ;;  %v3260_v52 = vld [vmem:[%s4986_s3 + $0x1d4] sm:$0xf0] }
  0x40   :  { %569 = vmatpush.bf16.msrb.mxu0 %v2160_v0  ;;  %v2211_v0 = vld [vmem:[%s4983_s1 + $0x68] sm:$0xf]  ;;  %v2807_v33 = vld [vmem:[%s4986_s3 + $0x2f0] sm:$0xf]  ;;  %v2655_v61 = vld [vmem:[%s4986_s3 + $0x1c0] sm:$0xf] }
  0x41   :  { %582 = vmatpush.bf16.msrb.mxu1 %v2164_v1  ;;  %595 = vmatpush.bf16.msrb.mxu2 %v2168_v2  ;;  %v2456_v1 = vor.u32 %v3208_v58, %v2455_v57  ;;  %v2511_v2 = vld [vmem:[%s4986_s3 + $0xa0] sm:$0xf]  ;;  %v2743_v37 = vld [vmem:[%s4986_s3 + $0x270] sm:$0xf]  ;;  %v3234_v41 = vld [vmem:[%s4986_s3 + $0x104] sm:$0xf0] }
  0x42   :  { %608 = vmatpush.bf16.msrb.mxu3 %v2172_v3  ;;  %v3222_v3 = vld [vmem:[%s4986_s3 + $0xa4] sm:$0xf0]  ;;  %v2871_v44 = vld [vmem:[%s4986_s3 + $0x370] sm:$0xf]  ;;  %v2863_v58 = vld [vmem:[%s4986_s3 + $0x360] sm:$0xf] }
  0x43   :  { %570 = vmatmul.bf16.vlgmr.msrb.gmra.mxu0 %v3675_v50  ;;  %v2512_v11 = vor.u32 %v3222_v3, %v2511_v2  ;;  %v2663_v47 = vld [vmem:[%s4986_s3 + $0x1d0] sm:$0xf]  ;;  %v3278_v54 = vld [vmem:[%s4986_s3 + $0x264] sm:$0xf0]  ;;  %v2872_v56 = vor.u32 %v3312_v45, %v2871_v44  ;;  %v3276_v2 = vld [vmem:[%s4986_s3 + $0x254] sm:$0xf0] }
  0x44   :  { %614 = vmatpush.bf16.msra.mxu0 %v2428_v4  ;;  %583 = vmatmul.bf16.vlgmr.msrb.gmra.mxu1 %v3675_v50  ;;  %v3146_v4 = vld [vmem:[%s4983_s1 + $0x88] sm:$0xf0]  ;;  %v2664_v60 = vor.u32 %v3260_v52, %v2663_v47  ;;  %v2855_v5 = vld [vmem:[%s4986_s3 + $0x350] sm:$0xf]  ;;  %v3308_v6 = vld [vmem:[%s4986_s3 + $0x354] sm:$0xf0] }
  0x45   :  { %596 = vmatmul.bf16.vlgmr.msrb.gmra.mxu2 %v3675_v50  ;;  %609 = vmatmul.bf16.vlgmr.msrb.gmra.mxu3 %v3675_v50  ;;  %v2647_v8 = vld [vmem:[%s4986_s3 + $0x1b0] sm:$0xf]  ;;  %v3286_v32 = vld [vmem:[%s4986_s3 + $0x2a4] sm:$0xf0]  ;;  %v3324_v47 = vld [vmem:[%s4986_s3 + $0x3d4] sm:$0xf0] }
  0x46   :  { %1546 = vmatpush.bf16.msra.mxu2 %v2552_v13  ;;  %1533 = vmatpush.bf16.msra.mxu1 %v2488_v17  ;;  %v3137_v13 = vld [vmem:[%s4983_s1 + $0x40] sm:$0xf0]  ;;  %v2679_v17 = vld [vmem:[%s4986_s3 + $0x1f0] sm:$0xf]  ;;  %v3326_v44 = vld [vmem:[%s4986_s3 + $0x3e4] sm:$0xf0] }
  0x47   :  { %1559 = vmatpush.bf16.msra.mxu3 %v2616_v24  ;;  %v2504_v24 = vor.u32 %v3220_v16, %v2503_v15  ;;  %v2176_v25 = vor.u32 %v3137_v13, %v2175_v10  ;;  %v2680_v31 = vor.u32 %v3264_v21, %v2679_v17  ;;  %v2783_v10 = vld [vmem:[%s4986_s3 + $0x2c0] sm:$0xf]  ;;  %v2856_v15 = vor.u32 %v3308_v6, %v2855_v5 }
  0x48   :  { %615 = vmatpush.bf16.msra.mxu0 %v2392_v12  ;;  %v2212_v12 = vor.u32 %v3146_v4, %v2211_v0  ;;  %v3258_v0 = vld [vmem:[%s4986_s3 + $0x1c4] sm:$0xf0]  ;;  %v2719_v13 = vld [vmem:[%s4986_s3 + $0x240] sm:$0xf] }
  0x49   :  { %v2847_v17 = vld [vmem:[%s4986_s3 + $0x340] sm:$0xf] }
  0x4a   :  { %1547 = vmatpush.bf16.msra.mxu2 %v2544_v23  ;;  %1534 = vmatpush.bf16.msra.mxu1 %v2480_v27  ;;  %v3236_v23 = vld [vmem:[%s4986_s3 + $0x114] sm:$0xf0]  ;;  %v2440_v27 = vor.u32 %v3204_v19, %v2439_v18  ;;  %v3306_v18 = vld [vmem:[%s4986_s3 + $0x344] sm:$0xf0]  ;;  %v2703_v52 = vld [vmem:[%s4986_s3 + $0x220] sm:$0xf] }
  0x4b   :  { %1560 = vmatpush.bf16.msra.mxu3 %v2608_v34  ;;  %v3296_v34 = vld [vmem:[%s4986_s3 + $0x2f4] sm:$0xf0]  ;;  %v2895_v5 = vld [vmem:[%s4986_s3 + $0x3a0] sm:$0xf] }
  0x4c   :  { %616 = vmatpush.bf16.msra.mxu0 %v2356_v26  ;;  %v2671_v26 = vld [vmem:[%s4986_s3 + $0x1e0] sm:$0xf]  ;;  %v2808_v43 = vor.u32 %v3296_v34, %v2807_v33  ;;  %v2631_v33 = vld [vmem:[%s4986_s3 + $0x190] sm:$0xf]  ;;  %v3252_v34 = vld [vmem:[%s4986_s3 + $0x194] sm:$0xf0] }
  0x4e   :  { %1548 = vmatpush.bf16.msra.mxu2 %v2536_v35  ;;  %1535 = vmatpush.bf16.msra.mxu1 %v2472_v40  ;;  %v2568_v35 = vor.u32 %v3236_v23, %v2567_v22  ;;  %v2559_v40 = vld [vmem:[%s4986_s3 + $0x100] sm:$0xf]  ;;  %v2775_v22 = vld [vmem:[%s4986_s3 + $0x2b0] sm:$0xf]  ;;  %v3288_v23 = vld [vmem:[%s4986_s3 + $0x2b4] sm:$0xf0] }
  0x4f   :  { %1561 = vmatpush.bf16.msra.mxu3 %v2600_v46  ;;  %v2672_v46 = vor.u32 %v3262_v36, %v2671_v26  ;;  %v2560_v55 = vor.u32 %v3234_v41, %v2559_v40  ;;  %v3272_v26 = vld [vmem:[%s4986_s3 + $0x234] sm:$0xf0]  ;;  %v2776_v28 = vor.u32 %v3288_v23, %v2775_v22  ;;  %v2632_v36 = vor.u32 %v3252_v34, %v2631_v33  ;;  %v3298_v22 = vld [vmem:[%s4986_s3 + $0x304] sm:$0xf0]  ;;  %v3215_v34 = vld [vmem:[%s4986_s3 + $0x74] sm:$0xf] }
  0x50   :  { %617 = vmatpush.bf16.msra.mxu0 %v2320_v38  ;;  %v3280_v38 = vld [vmem:[%s4986_s3 + $0x274] sm:$0xf0] }
  0x51   :  { %v2744_v48 = vor.u32 %v3280_v38, %v2743_v37  ;;  %v2623_v37 = vld [vmem:[%s4986_s3 + $0x180] sm:$0xf]  ;;  %v3250_v38 = vld [vmem:[%s4986_s3 + $0x184] sm:$0xf0]  ;;  %v3328_v40 = vld [vmem:[%s4986_s3 + $0x3f4] sm:$0xf0] }
  0x52   :  { %1549 = vmatpush.bf16.msra.mxu2 %v2528_v49  ;;  %1536 = vmatpush.bf16.msra.mxu1 %v2464_v53  ;;  %v2799_v49 = vld [vmem:[%s4986_s3 + $0x2e0] sm:$0xf]  ;;  %v2624_v41 = vor.u32 %v3250_v38, %v2623_v37  ;;  %v2489_v38 = vld [vmem:[%s4986_s3 + $0x78] sm:$0xf0] }
  0x53   :  { %1562 = vmatpush.bf16.msra.mxu3 %v2592_v59  ;;  %v2735_v53 = vld [vmem:[%s4986_s3 + $0x260] sm:$0xf]  ;;  %v3310_v59 = vld [vmem:[%s4986_s3 + $0x364] sm:$0xf0] }
  0x54   :  { %618 = vmatpush.bf16.msra.mxu0 %v2284_v51  ;;  %v3294_v51 = vld [vmem:[%s4986_s3 + $0x2e4] sm:$0xf0]  ;;  %v2864_v3 = vor.u32 %v3310_v59, %v2863_v58  ;;  %v2903_v59 = vld [vmem:[%s4986_s3 + $0x3b0] sm:$0xf] }
  0x55   :  { %v2800_v57 = vor.u32 %v3294_v51, %v2799_v49  ;;  %v2911_v49 = vld [vmem:[%s4986_s3 + $0x3c0] sm:$0xf]  ;;  %v3322_v51 = vld [vmem:[%s4986_s3 + $0x3c4] sm:$0xf0] }
  0x56   :  { %1550 = vmatpush.bf16.msra.mxu2 %v2520_v62  ;;  %1537 = vmatpush.bf16.msra.mxu1 %v2456_v1  ;;  %v2791_v62 = vld [vmem:[%s4986_s3 + $0x2d0] sm:$0xf] }
  0x57   :  { %1563 = vmatpush.bf16.msra.mxu3 %v2584_v7  ;;  %v2727_v1 = vld [vmem:[%s4986_s3 + $0x250] sm:$0xf]  ;;  %v2656_v7 = vor.u32 %v3258_v0, %v2655_v61 }
  0x58   :  { %619 = vmatpush.bf16.msra.mxu0 %v2248_v63  ;;  %v3292_v63 = vld [vmem:[%s4986_s3 + $0x2d4] sm:$0xf0]  ;;  %v2728_v9 = vor.u32 %v3276_v2, %v2727_v1  ;;  %v2759_v61 = vld [vmem:[%s4986_s3 + $0x290] sm:$0xf] }
  0x59   :  { %v2792_v4 = vor.u32 %v3292_v63, %v2791_v62  ;;  %v2695_v62 = vld [vmem:[%s4986_s3 + $0x210] sm:$0xf]  ;;  %v3268_v63 = vld [vmem:[%s4986_s3 + $0x214] sm:$0xf0] }
  0x5a   :  { %1551 = vmatpush.bf16.msra.mxu2 %v2512_v11  ;;  %1538 = vmatpush.bf16.msra.mxu1 %v2448_v14  ;;  %v3290_v11 = vld [vmem:[%s4986_s3 + $0x2c4] sm:$0xf0]  ;;  %v2696_v1 = vor.u32 %v3268_v63, %v2695_v62  ;;  %v2617_v62 = vld [vmem:[%s4986_s3 + $0x178] sm:$0xf0]  ;;  %v3211_v63 = vld [vmem:[%s4986_s3 + $0x54] sm:$0xf] }
  0x5b   :  { %1564 = vmatpush.bf16.msra.mxu3 %v2576_v20  ;;  %v3274_v14 = vld [vmem:[%s4986_s3 + $0x244] sm:$0xf0]  ;;  %v2784_v16 = vor.u32 %v3290_v11, %v2783_v10  ;;  %v2639_v20 = vld [vmem:[%s4986_s3 + $0x1a0] sm:$0xf] }
  0x5c   :  { %620 = vmatpush.bf16.msra.mxu0 %v2212_v12  ;;  %v3256_v12 = vld [vmem:[%s4986_s3 + $0x1b4] sm:$0xf0]  ;;  %v2720_v21 = vor.u32 %v3274_v14, %v2719_v13  ;;  %v2687_v11 = vld [vmem:[%s4986_s3 + $0x200] sm:$0xf] }
  0x5d   :  { %v2648_v19 = vor.u32 %v3256_v12, %v2647_v8  ;;  %v2751_v8 = vld [vmem:[%s4986_s3 + $0x280] sm:$0xf]  ;;  %v3266_v12 = vld [vmem:[%s4986_s3 + $0x204] sm:$0xf0] }
  0x5e   :  { %1552 = vmatpush.bf16.msra.mxu2 %v2504_v24  ;;  %1539 = vmatpush.bf16.msra.mxu1 %v2440_v27  ;;  %v3254_v24 = vld [vmem:[%s4986_s3 + $0x1a4] sm:$0xf0]  ;;  %v2848_v27 = vor.u32 %v3306_v18, %v2847_v17  ;;  %v2688_v13 = vor.u32 %v3266_v12, %v2687_v11  ;;  %v2887_v17 = vld [vmem:[%s4986_s3 + $0x390] sm:$0xf]  ;;  %v3316_v18 = vld [vmem:[%s4986_s3 + $0x394] sm:$0xf0] }
  0x5f   :  { %1565 = vmatpush.bf16.msra.mxu3 %v2568_v35  ;;  %v2640_v29 = vor.u32 %v3254_v24, %v2639_v20  ;;  %v2888_v20 = vor.u32 %v3316_v18, %v2887_v17  ;;  %v2879_v24 = vld [vmem:[%s4986_s3 + $0x380] sm:$0xf]  ;;  %v3229_v12 = vld [vmem:[%s4986_s3 + $0xe4] sm:$0xf]  ;;  %v2609_v17 = vld [vmem:[%s4986_s3 + $0x168] sm:$0xf0] }
  0x60   :  { %621 = vmatpush.bf16.msra.mxu0 %v2176_v25  ;;  %v2711_v25 = vld [vmem:[%s4986_s3 + $0x230] sm:$0xf]  ;;  %v2975_v18 = vld [vmem:[%s4986_s3 + $0x440] sm:$0xf] }
  0x61   :  { %v2712_v30 = vor.u32 %v3272_v26, %v2711_v25  ;;  %v3314_v25 = vld [vmem:[%s4986_s3 + $0x384] sm:$0xf0] }
  0x62   :  { %1553 = vmatpush.bf16.msra.mxu2 %v2496_v39  ;;  %1540 = vmatpush.bf16.msra.mxu1 %v2432_v42  ;;  %v2935_v39 = vld [vmem:[%s4986_s3 + $0x3f0] sm:$0xf]  ;;  %v2880_v26 = vor.u32 %v3314_v25, %v2879_v24 }
  0x63   :  { %622 = vmatmul.bf16.vlgmr.msra.gmra.mxu0 %v3675_v50  ;;  %v2736_v50 = vor.u32 %v3278_v54, %v2735_v53  ;;  %1566 = vmatpush.bf16.msra.mxu3 %v2560_v55  ;;  %v2936_v42 = vor.u32 %v3328_v40, %v2935_v39  ;;  %v3270_v53 = vld [vmem:[%s4986_s3 + $0x224] sm:$0xf0]  ;;  %v2912_v55 = vor.u32 %v3322_v51, %v2911_v49 }
  0x64   :  { %1572 = vmatpush.bf16.msrb.mxu0 %v2680_v31  ;;  %v2767_v31 = vld [vmem:[%s4986_s3 + $0x2a0] sm:$0xf]  ;;  %v2704_v54 = vor.u32 %v3270_v53, %v2703_v52  ;;  %v3213_v52 = vld [vmem:[%s4986_s3 + $0x64] sm:$0xf]  ;;  %v2481_v53 = vld [vmem:[%s4986_s3 + $0x68] sm:$0xf0] }
  0x65   :  { %v2768_v35 = vor.u32 %v3286_v32, %v2767_v31 }
  0x66   :  { %1598 = vmatpush.bf16.msrb.mxu2 %v2808_v43  ;;  %1585 = vmatpush.bf16.msrb.mxu1 %v2744_v48  ;;  %v2927_v43 = vld [vmem:[%s4986_s3 + $0x3e0] sm:$0xf] }
  0x67   :  { %1611 = vmatpush.bf16.msrb.mxu3 %v2872_v56  ;;  %v2928_v45 = vor.u32 %v3326_v44, %v2927_v43  ;;  %v2839_v56 = vld [vmem:[%s4986_s3 + $0x330] sm:$0xf] }
  0x68   :  { %1573 = vmatpush.bf16.msrb.mxu0 %v2672_v46  ;;  %v2919_v46 = vld [vmem:[%s4986_s3 + $0x3d0] sm:$0xf] }
  0x69   :  { %v2920_v48 = vor.u32 %v3324_v47, %v2919_v46  ;;  %v2492_v46 = vor.u32 %v3215_v34, %v2489_v38  ;;  %v2991_v47 = vld [vmem:[%s4986_s3 + $0x460] sm:$0xf]  ;;  %v3336_v34 = vld [vmem:[%s4986_s3 + $0x434] sm:$0xf0] }
  0x6a   :  { %1599 = vmatpush.bf16.msrb.mxu2 %v2800_v57  ;;  %1586 = vmatpush.bf16.msrb.mxu1 %v2736_v50  ;;  %v3304_v57 = vld [vmem:[%s4986_s3 + $0x334] sm:$0xf0] }
  0x6b   :  { %1612 = vmatpush.bf16.msrb.mxu3 %v2864_v3  ;;  %v2840_v58 = vor.u32 %v3304_v57, %v2839_v56  ;;  %v3284_v50 = vld [vmem:[%s4986_s3 + $0x294] sm:$0xf0]  ;;  %v2831_v3 = vld [vmem:[%s4986_s3 + $0x320] sm:$0xf]  ;;  %v3231_v57 = vld [vmem:[%s4986_s3 + $0xf4] sm:$0xf] }
  0x6c   :  { %1574 = vmatpush.bf16.msrb.mxu0 %v2664_v60  ;;  %v3320_v60 = vld [vmem:[%s4986_s3 + $0x3b4] sm:$0xf0]  ;;  %v2760_v0 = vor.u32 %v3284_v50, %v2759_v61 }
  0x6d   :  { %v2904_v2 = vor.u32 %v3320_v60, %v2903_v59  ;;  %v3247_v59 = vld [vmem:[%s4986_s3 + $0x174] sm:$0xf] }
  0x6e   :  { %1600 = vmatpush.bf16.msrb.mxu2 %v2792_v4  ;;  %1587 = vmatpush.bf16.msrb.mxu1 %v2728_v9  ;;  %v3302_v4 = vld [vmem:[%s4986_s3 + $0x324] sm:$0xf0] }
  0x6f   :  { %1613 = vmatpush.bf16.msrb.mxu3 %v2856_v15  ;;  %v2832_v6 = vor.u32 %v3302_v4, %v2831_v3  ;;  %v3282_v9 = vld [vmem:[%s4986_s3 + $0x284] sm:$0xf0]  ;;  %v2823_v15 = vld [vmem:[%s4986_s3 + $0x310] sm:$0xf]  ;;  %v3340_v3 = vld [vmem:[%s4986_s3 + $0x454] sm:$0xf0] }
  0x70   :  { %1575 = vmatpush.bf16.msrb.mxu0 %v2656_v7  ;;  %v3318_v7 = vld [vmem:[%s4986_s3 + $0x3a4] sm:$0xf0]  ;;  %v2752_v10 = vor.u32 %v3282_v9, %v2751_v8 }
  0x71   :  { %v2896_v14 = vor.u32 %v3318_v7, %v2895_v5  ;;  %v2473_v5 = vld [vmem:[%s4986_s3 + $0x58] sm:$0xf0] }
  0x72   :  { %1601 = vmatpush.bf16.msrb.mxu2 %v2784_v16  ;;  %1588 = vmatpush.bf16.msrb.mxu1 %v2720_v21  ;;  %v3300_v16 = vld [vmem:[%s4986_s3 + $0x314] sm:$0xf0]  ;;  %v2815_v21 = vld [vmem:[%s4986_s3 + $0x300] sm:$0xf] }
  0x73   :  { %1614 = vmatpush.bf16.msrb.mxu3 %v2848_v27  ;;  %v2816_v23 = vor.u32 %v3298_v22, %v2815_v21  ;;  %v4271_v27 = vld [vmem:[%s4985_s2] sm:$0xff]  ;;  %v2465_v21 = vld [vmem:[%s4986_s3 + $0x48] sm:$0xf0] }
  0x74   :  { %1576 = vmatpush.bf16.msrb.mxu0 %v2648_v19  ;;  %v2824_v19 = vor.u32 %v3300_v16, %v2823_v15  ;;  %v126_v40 = vperm.slane %v4271_v27, 2  ;;  %v2476_v16 = vor.u32 %v3211_v63, %v2473_v5  ;;  %v3203_v63 = vld [vmem:[%s4986_s3 + $0x14] sm:$0xf] }
  0x76   :  { %1602 = vmatpush.bf16.msrb.mxu2 %v2776_v28  ;;  %1589 = vmatpush.bf16.msrb.mxu1 %v2712_v30  ;;  %v124_v28 = vperm.slane %v4271_v27, 0 }
  0x77   :  { %1615 = vmatpush.bf16.msrb.mxu3 %v2840_v58  ;;  %v2553_v58 = vld [vmem:[%s4986_s3 + $0xf8] sm:$0xf0] }
  0x78   :  { %1577 = vmatpush.bf16.msrb.mxu0 %v2640_v29  ;;  %v125_v29 = vperm.slane %v4271_v27, 1  ;;  %v2556_v7 = vor.u32 %v3231_v57, %v2553_v58  ;;  %v2521_v57 = vld [vmem:[%s4986_s3 + $0xb8] sm:$0xf0]  ;;  %v3239_v58 = vld [vmem:[%s4986_s3 + $0x134] sm:$0xf] }
  0x7a   :  { %1603 = vmatpush.bf16.msrb.mxu2 %v2768_v35  ;;  %1590 = vmatpush.bf16.msrb.mxu1 %v2704_v54  ;;  %v2999_v35 = vld [vmem:[%s4986_s3 + $0x470] sm:$0xf] }
  0x7b   :  { %1616 = vmatpush.bf16.msrb.mxu3 %v2832_v6 }
  0x7c   :  { %1578 = vmatpush.bf16.msrb.mxu0 %v2632_v36  ;;  %v3344_v36 = vld [vmem:[%s4986_s3 + $0x474] sm:$0xf0] }
  0x7d   :  { %v3000_v43 = vor.u32 %v3344_v36, %v2999_v35  ;;  %v3207_v35 = vld [vmem:[%s4986_s3 + $0x34] sm:$0xf]  ;;  %v2457_v36 = vld [vmem:[%s4986_s3 + $0x38] sm:$0xf0] }
  0x7e   :  { %1604 = vmatpush.bf16.msrb.mxu2 %v2760_v0  ;;  %1591 = vmatpush.bf16.msrb.mxu1 %v2696_v1  ;;  %v2983_v0 = vld [vmem:[%s4986_s3 + $0x450] sm:$0xf] }
  0x7f   :  { %1617 = vmatpush.bf16.msrb.mxu3 %v2824_v19  ;;  %v2984_v11 = vor.u32 %v3340_v3, %v2983_v0  ;;  %v3338_v19 = vld [vmem:[%s4986_s3 + $0x444] sm:$0xf0]  ;;  %v2441_v0 = vld [vmem:[%s4986_s3 + $0x18] sm:$0xf0]  ;;  %v2513_v3 = vld [vmem:[%s4986_s3 + $0xa8] sm:$0xf0] }
  0x80   :  { %1579 = vmatpush.bf16.msrb.mxu0 %v2624_v41 }
  0x82   :  { %1605 = vmatpush.bf16.msrb.mxu2 %v2752_v10  ;;  %1592 = vmatpush.bf16.msrb.mxu1 %v2688_v13  ;;  %v2620_v10 = vor.u32 %v3247_v59, %v2617_v62  ;;  %v2545_v13 = vld [vmem:[%s4986_s3 + $0xe8] sm:$0xf0]  ;;  %v129_v62 = vperm.slane %v4271_v27, 5 }
  0x83   :  { %1618 = vmatpush.bf16.msrb.mxu3 %v2816_v23  ;;  %v2548_v23 = vor.u32 %v3229_v12, %v2545_v13  ;;  %v2444_v13 = vor.u32 %v3203_v63, %v2441_v0 }
  0x84   :  { %1624 = vmatpush.bf16.msra.mxu0 %v2936_v42  ;;  %v127_v42 = vperm.slane %v4271_v27, 3 }
  0x88   :  { %1625 = vmatpush.bf16.msra.mxu0 %v2928_v45 }
  0x8c   :  { %1626 = vmatpush.bf16.msra.mxu0 %v2920_v48  ;;  %v3342_v48 = vld [vmem:[%s4986_s3 + $0x464] sm:$0xf0] }
  0x8d   :  { %v2992_v50 = vor.u32 %v3342_v48, %v2991_v47  ;;  %v3334_v47 = vld [vmem:[%s4986_s3 + $0x424] sm:$0xf0]  ;;  %v3205_v48 = vld [vmem:[%s4986_s3 + $0x24] sm:$0xf] }
  0x90   :  { %1627 = vmatpush.bf16.msra.mxu0 %v2912_v55 }
  0x94   :  { %1628 = vmatpush.bf16.msra.mxu0 %v2904_v2  ;;  %v2484_v2 = vor.u32 %v3213_v52, %v2481_v53  ;;  %v128_v53 = vperm.slane %v4271_v27, 4 }
  0x98   :  { %1629 = vmatpush.bf16.msra.mxu0 %v2896_v14  ;;  %v3245_v14 = vld [vmem:[%s4986_s3 + $0x164] sm:$0xf] }
  0x99   :  { %v2612_v25 = vor.u32 %v3245_v14, %v2609_v17  ;;  %v2433_v14 = vld [vmem:[%s4986_s3 + $0x8] sm:$0xf0]  ;;  %v3330_v17 = vld [vmem:[%s4986_s3 + $0x404] sm:$0xf0] }
  0x9c   :  { %1630 = vmatpush.bf16.msra.mxu0 %v2888_v20  ;;  %v3209_v20 = vld [vmem:[%s4986_s3 + $0x44] sm:$0xf] }
  0xa0   :  { %1631 = vmatpush.bf16.msra.mxu0 %v2880_v26  ;;  %v519_v30 = vpop.f32.mrf.mxu0  ;;  %v2976_v26 = vor.u32 %v3338_v19, %v2975_v18  ;;  %v3279_v19 = vld [vmem:[%s4986_s3 + $0x274] sm:$0xf] }
  0xa1   :  { %v520_v31 = vadd.f32 %v519_v30, %v124_v28  ;;  %v532_v32 = vpop.f32.mrf.mxu1  ;;  %v3227_v28 = vld [vmem:[%s4986_s3 + $0xd4] sm:$0xf] }
  0xa2   :  { %v533_v33 = vadd.f32 %v532_v32, %v125_v29  ;;  %v2537_v29 = vld [vmem:[%s4986_s3 + $0xd8] sm:$0xf0]  ;;  %v3243_v30 = vld [vmem:[%s4986_s3 + $0x154] sm:$0xf] }
  0xa3   :  { %vm627_vm0 = vcmp.gt.f32.partialorder %v520_v31, 0.0  ;;  %v636_v37 = vmul.f32 0.01, %v520_v31  ;;  %v2601_v32 = vld [vmem:[%s4986_s3 + $0x158] sm:$0xf0] }
  0xa4   :  { %vm628_vm1 = vcmp.gt.f32.partialorder %v533_v33, 0.0  ;;  %v637_v39 = vmul.f32 0.01, %v533_v33  ;;  %v2604_v38 = vor.u32 %v3243_v30, %v2601_v32  ;;  %v2505_v30 = vld [vmem:[%s4986_s3 + $0x98] sm:$0xf0]  ;;  %v131_v32 = vperm.slane %v4271_v27, 7 }
  0xa5   :  { %v645_v41 = vsel %vm627_vm0, %v520_v31, %v636_v37  ;;  %v2468_v31 = vor.u32 %v3209_v20, %v2465_v21  ;;  %v2540_v37 = vor.u32 %v3227_v28, %v2537_v29  ;;  %v2745_v20 = vld [vmem:[%s4986_s3 + $0x278] sm:$0xf0]  ;;  %v3263_v21 = vld [vmem:[%s4986_s3 + $0x1f4] sm:$0xf]  ;;  %v130_v28 = vperm.slane %v4271_v27, 6 }
  0xa6   :  { %v4289_v44 = vpack.c.bf16 %v645_v41, %v645_v41  ;;  %v646_v45 = vsel %vm628_vm1, %v533_v33, %v637_v39  ;;  %v2967_v33 = vld [vmem:[%s4986_s3 + $0x430] sm:$0xf]  ;;  %v2529_v41 = vld [vmem:[%s4986_s3 + $0xc8] sm:$0xf0]  ;;  %vm2114_vm1 = vcmask 408576  }
  0xa7   :  { %v4297_v49 = vpack.c.bf16 %v646_v45, %v646_v45  ;;  %v2968_v39 = vor.u32 %v3336_v34, %v2967_v33  ;;  %v2593_v45 = vld [vmem:[%s4986_s3 + $0x148] sm:$0xf0] }
  0xa8   :  { %v521_v56 = vpop.f32.mrf.mxu0  ;;  %1541 = vmatmul.bf16.vlgmr.msra.gmra.mxu1 %v4289_v44  ;;  %v2737_v27 = vld [vmem:[%s4986_s3 + $0x268] sm:$0xf0] }
  0xa9   :  { %v545_v51 = vpop.f32.mrf.mxu2  ;;  %v534_v61 = vpop.f32.mrf.mxu1  ;;  %1554 = vmatmul.bf16.vlgmr.msra.gmra.mxu2 %v4297_v49  ;;  %1637 = vmatpush.bf16.msra.mxu1 %v3000_v43  ;;  %v2460_v43 = vor.u32 %v3207_v35, %v2457_v36  ;;  %v3223_v56 = vld [vmem:[%s4986_s3 + $0xb4] sm:$0xf]  ;;  %v2569_v36 = vld [vmem:[%s4986_s3 + $0x118] sm:$0xf0] }
  0xaa   :  { %v546_v54 = vadd.f32 %v545_v51, %v126_v40  ;;  %v558_v55 = vpop.f32.mrf.mxu3  ;;  %1650 = vmatpush.bf16.msra.mxu2 %v2492_v46  ;;  %v3225_v40 = vld [vmem:[%s4986_s3 + $0xc4] sm:$0xf]  ;;  %v2959_v46 = vld [vmem:[%s4986_s3 + $0x420] sm:$0xf]  ;;  %v2449_v51 = vld [vmem:[%s4986_s3 + $0x28] sm:$0xf0] }
  0xab   :  { %v559_v60 = vadd.f32 %v558_v55, %v127_v42  ;;  %v3241_v42 = vld [vmem:[%s4986_s3 + $0x144] sm:$0xf]  ;;  %v2532_v52 = vor.u32 %v3225_v40, %v2529_v41  ;;  %v2960_v55 = vor.u32 %v3334_v47, %v2959_v46  ;;  %v2452_v59 = vor.u32 %v3205_v48, %v2449_v51  ;;  %v2951_v61 = vld [vmem:[%s4986_s3 + $0x410] sm:$0xf]  ;;  %v3235_v35 = vld [vmem:[%s4986_s3 + $0x114] sm:$0xf] }
  0xac   :  { %vm629_vm2 = vcmp.gt.f32.partialorder %v546_v54, 0.0  ;;  %v638_v1 = vmul.f32 0.01, %v546_v54  ;;  %v3277_v40 = vld [vmem:[%s4986_s3 + $0x264] sm:$0xf] }
  0xad   :  { %vm630_vm3 = vcmp.gt.f32.partialorder %v559_v60, 0.0  ;;  %v639_v4 = vmul.f32 0.01, %v559_v60  ;;  %1638 = vmatpush.bf16.msra.mxu1 %v2992_v50  ;;  %v3332_v50 = vld [vmem:[%s4986_s3 + $0x414] sm:$0xf0] }
  0xae   :  { %v647_v6 = vsel %vm629_vm2, %v546_v54, %v638_v1  ;;  %1651 = vmatpush.bf16.msra.mxu2 %v2484_v2  ;;  %v2596_v54 = vor.u32 %v3241_v42, %v2593_v45  ;;  %v2524_v1 = vor.u32 %v3223_v56, %v2521_v57  ;;  %v3221_v2 = vld [vmem:[%s4986_s3 + $0xa4] sm:$0xf]  ;;  %v2748_v45 = vor.u32 %v3279_v19, %v2745_v20  ;;  %v2673_v47 = vld [vmem:[%s4986_s3 + $0x1e8] sm:$0xf0] }
  0xaf   :  { %v4331_v8 = vpack.c.bf16 %v647_v6, %v647_v6  ;;  %v648_v9 = vsel %vm630_vm3, %v559_v60, %v639_v4  ;;  %v2585_v60 = vld [vmem:[%s4986_s3 + $0x138] sm:$0xf0]  ;;  %v2952_v6 = vor.u32 %v3332_v50, %v2951_v61  ;;  %v3261_v41 = vld [vmem:[%s4986_s3 + $0x1e4] sm:$0xf]  ;;  %v2497_v51 = vld [vmem:[%s4986_s3 + $0x88] sm:$0xf0] }
  0xb0   :  { %v4342_v15 = vpack.c.bf16 %v648_v9, %v648_v9  ;;  %v2588_v5 = vor.u32 %v3239_v58, %v2585_v60  ;;  %v2577_v9 = vld [vmem:[%s4986_s3 + $0x128] sm:$0xf0]  ;;  %v3217_v48 = vld [vmem:[%s4986_s3 + $0x84] sm:$0xf]  ;;  %v3295_v58 = vld [vmem:[%s4986_s3 + $0x2f4] sm:$0xf]  ;;  %v2676_v0 = vor.u32 %v3261_v41, %v2673_v47 }
  0xb1   :  { %1567 = vmatmul.bf16.vlgmr.msra.gmra.mxu3 %v4331_v8  ;;  %v547_v22 = vpop.f32.mrf.mxu2  ;;  %1639 = vmatpush.bf16.msra.mxu1 %v2984_v11  ;;  %v3233_v56 = vld [vmem:[%s4986_s3 + $0x104] sm:$0xf]  ;;  %v2561_v57 = vld [vmem:[%s4986_s3 + $0x108] sm:$0xf0]  ;;  %v2809_v61 = vld [vmem:[%s4986_s3 + $0x2f8] sm:$0xf0] }
  0xb2   :  { %1580 = vmatmul.bf16.vlgmr.msrb.gmra.mxu0 %v4342_v15  ;;  %1663 = vmatpush.bf16.msra.mxu3 %v2556_v7  ;;  %v560_v24 = vpop.f32.mrf.mxu3  ;;  %v3237_v7 = vld [vmem:[%s4986_s3 + $0x124] sm:$0xf]  ;;  %v2681_v22 = vld [vmem:[%s4986_s3 + $0x1f8] sm:$0xf0]  ;;  %v3311_v50 = vld [vmem:[%s4986_s3 + $0x374] sm:$0xf] }
  0xb3   :  { %1676 = vmatpush.bf16.msrb.mxu0 %v2620_v10  ;;  %1652 = vmatpush.bf16.msra.mxu2 %v2476_v16  ;;  %v3201_v10 = vld [vmem:[%s4986_s3 + $0x4] sm:$0xf]  ;;  %v2943_v16 = vld [vmem:[%s4986_s3 + $0x400] sm:$0xf]  ;;  %v2516_v24 = vor.u32 %v3221_v2, %v2513_v3  ;;  %v2580_v29 = vor.u32 %v3237_v7, %v2577_v9  ;;  %v2740_v3 = vor.u32 %v3277_v40, %v2737_v27  ;;  %v3275_v7 = vld [vmem:[%s4986_s3 + $0x254] sm:$0xf] }
  0xb4   :  { %v2436_v33 = vor.u32 %v3201_v10, %v2433_v14  ;;  %v2944_v34 = vor.u32 %v3330_v17, %v2943_v16  ;;  %v2729_v9 = vld [vmem:[%s4986_s3 + $0x258] sm:$0xf0]  ;;  %v2801_v19 = vld [vmem:[%s4986_s3 + $0x2e8] sm:$0xf0]  ;;  %v3309_v20 = vld [vmem:[%s4986_s3 + $0x364] sm:$0xf] }
  0xb5   :  { %1640 = vmatpush.bf16.msra.mxu1 %v2976_v26  ;;  %v2713_v40 = vld [vmem:[%s4986_s3 + $0x238] sm:$0xf0]  ;;  %v3255_v27 = vld [vmem:[%s4986_s3 + $0x1b4] sm:$0xf]  ;;  %v2785_v47 = vld [vmem:[%s4986_s3 + $0x2c8] sm:$0xf0] }
  0xb6   :  { %1664 = vmatpush.bf16.msra.mxu3 %v2548_v23  ;;  %v2649_v41 = vld [vmem:[%s4986_s3 + $0x1b8] sm:$0xf0]  ;;  %vm2135_vm2 = vcmask 15360  }
  0xb7   :  { %1677 = vmatpush.bf16.msrb.mxu0 %v2612_v25  ;;  %1653 = vmatpush.bf16.msra.mxu2 %v2468_v31  ;;  %v3219_v25 = vld [vmem:[%s4986_s3 + $0x94] sm:$0xf] }
  0xb8   :  { %v2508_v46 = vor.u32 %v3219_v25, %v2505_v30 }
  0xb9   :  { %1641 = vmatpush.bf16.msra.mxu1 %v2968_v39  ;;  %v2684_v39 = vor.u32 %v3263_v21, %v2681_v22  ;;  %v2732_v21 = vor.u32 %v3275_v7, %v2729_v9  ;;  %v2865_v22 = vld [vmem:[%s4986_s3 + $0x368] sm:$0xf0] }
  0xba   :  { %1665 = vmatpush.bf16.msra.mxu3 %v2540_v37  ;;  %v2769_v7 = vld [vmem:[%s4986_s3 + $0x2a8] sm:$0xf0] }
  0xbb   :  { %1678 = vmatpush.bf16.msrb.mxu0 %v2604_v38  ;;  %1654 = vmatpush.bf16.msra.mxu2 %v2460_v43 }
  0xbd   :  { %1642 = vmatpush.bf16.msra.mxu1 %v2960_v55  ;;  %v2572_v55 = vor.u32 %v3235_v35, %v2569_v36  ;;  %v3307_v36 = vld [vmem:[%s4986_s3 + $0x354] sm:$0xf] }
  0xbe   :  { %1666 = vmatpush.bf16.msra.mxu3 %v2532_v52 }
  0xbf   :  { %1679 = vmatpush.bf16.msrb.mxu0 %v2596_v54  ;;  %1655 = vmatpush.bf16.msra.mxu2 %v2452_v59 }
  0xc0   :  { %v571_v4 = vpop.f32.mrf.mxu0 }
  0xc1   :  { %v572_v11 = vadd.f32 %v571_v4, %v128_v53  ;;  %v584_v12 = vpop.f32.mrf.mxu1  ;;  %1643 = vmatpush.bf16.msra.mxu1 %v2952_v6  ;;  %v2665_v4 = vld [vmem:[%s4986_s3 + $0x1d8] sm:$0xf0]  ;;  %v2500_v6 = vor.u32 %v3217_v48, %v2497_v51  ;;  %v2652_v51 = vor.u32 %v3255_v27, %v2649_v41  ;;  %v2993_v41 = vld [vmem:[%s4986_s3 + $0x468] sm:$0xf0] }
  0xc2   :  { %v585_v18 = vadd.f32 %v584_v12, %v129_v62  ;;  %1667 = vmatpush.bf16.msra.mxu3 %v2524_v1  ;;  %v2873_v62 = vld [vmem:[%s4986_s3 + $0x378] sm:$0xf0]  ;;  %v3259_v1 = vld [vmem:[%s4986_s3 + $0x1d4] sm:$0xf]  ;;  %v2564_v12 = vor.u32 %v3233_v56, %v2561_v57  ;;  %v3253_v56 = vld [vmem:[%s4986_s3 + $0x1a4] sm:$0xf] }
  0xc3   :  { %vm631_vm4 = vcmp.gt.f32.partialorder %v572_v11, 0.0  ;;  %v640_v23 = vmul.f32 0.01, %v572_v11  ;;  %1680 = vmatpush.bf16.msrb.mxu0 %v2588_v5  ;;  %1656 = vmatpush.bf16.msra.mxu2 %v2444_v13  ;;  %v2812_v13 = vor.u32 %v3295_v58, %v2809_v61  ;;  %v2876_v16 = vor.u32 %v3311_v50, %v2873_v62  ;;  %v2641_v57 = vld [vmem:[%s4986_s3 + $0x1a8] sm:$0xf0] }
  0xc4   :  { %vm632_vm5 = vcmp.gt.f32.partialorder %v585_v18, 0.0  ;;  %v641_v26 = vmul.f32 0.01, %v585_v18  ;;  %v2668_v17 = vor.u32 %v3259_v1, %v2665_v4  ;;  %v3287_v61 = vld [vmem:[%s4986_s3 + $0x2b4] sm:$0xf] }
  0xc5   :  { %v649_v31 = vsel %vm631_vm4, %v572_v11, %v640_v23  ;;  %1644 = vmatpush.bf16.msra.mxu1 %v2944_v34  ;;  %v3257_v23 = vld [vmem:[%s4986_s3 + $0x1c4] sm:$0xf]  ;;  %v2793_v34 = vld [vmem:[%s4986_s3 + $0x2d8] sm:$0xf0]  ;;  %v3267_v1 = vld [vmem:[%s4986_s3 + $0x214] sm:$0xf] }
  0xc6   :  { %v4485_v37 = vpack.c.bf16 %v649_v31, %v649_v31  ;;  %v650_v38 = vsel %vm632_vm5, %v585_v18, %v641_v26  ;;  %1668 = vmatpush.bf16.msra.mxu3 %v2516_v24  ;;  %v3293_v18 = vld [vmem:[%s4986_s3 + $0x2e4] sm:$0xf]  ;;  %v2657_v24 = vld [vmem:[%s4986_s3 + $0x1c8] sm:$0xf0]  ;;  %v2868_v31 = vor.u32 %v3309_v20, %v2865_v22  ;;  %v2777_v50 = vld [vmem:[%s4986_s3 + $0x2b8] sm:$0xf0] }
  0xc7   :  { %v4496_v42 = vpack.c.bf16 %v650_v38, %v650_v38  ;;  %1681 = vmatpush.bf16.msrb.mxu0 %v2580_v29  ;;  %1657 = vmatpush.bf16.msra.mxu2 %v2436_v33  ;;  %v3273_v26 = vld [vmem:[%s4986_s3 + $0x244] sm:$0xf]  ;;  %v2804_v30 = vor.u32 %v3293_v18, %v2801_v19  ;;  %v3291_v33 = vld [vmem:[%s4986_s3 + $0x2d4] sm:$0xf]  ;;  %v2857_v38 = vld [vmem:[%s4986_s3 + $0x358] sm:$0xf0] }
  0xc8   :  { %v597_v43 = vpop.f32.mrf.mxu2  ;;  %v610_v53 = vpop.f32.mrf.mxu3  ;;  %1593 = vmatmul.bf16.vlgmr.msrb.gmra.mxu1 %v4485_v37  ;;  %v2633_v4 = vld [vmem:[%s4986_s3 + $0x198] sm:$0xf0]  ;;  %v2689_v20 = vld [vmem:[%s4986_s3 + $0x208] sm:$0xf0] }
  0xc9   :  { %v598_v52 = vadd.f32 %v597_v43, %v130_v28  ;;  %v573_v54 = vpop.f32.mrf.mxu0  ;;  %v611_v59 = vadd.f32 %v610_v53, %v131_v32  ;;  %v586_v60 = vpop.f32.mrf.mxu1  ;;  %1606 = vmatmul.bf16.vlgmr.msrb.gmra.mxu2 %v4496_v42  ;;  %1689 = vmatpush.bf16.msrb.mxu1 %v2684_v39  ;;  %v2721_v28 = vld [vmem:[%s4986_s3 + $0x248] sm:$0xf0]  ;;  %v2660_v32 = vor.u32 %v3257_v23, %v2657_v24  ;;  %v3271_v39 = vld [vmem:[%s4986_s3 + $0x234] sm:$0xf]  ;;  %v3001_v24 = vld [vmem:[%s4986_s3 + $0x478] sm:$0xf0] }
  0xca   :  { %1669 = vmatpush.bf16.msra.mxu3 %v2508_v46  ;;  %v2724_v35 = vor.u32 %v3273_v26, %v2721_v28  ;;  %v2796_v43 = vor.u32 %v3291_v33, %v2793_v34  ;;  %v3289_v46 = vld [vmem:[%s4986_s3 + $0x2c4] sm:$0xf]  ;;  %v2716_v48 = vor.u32 %v3271_v39, %v2713_v40  ;;  %v2849_v53 = vld [vmem:[%s4986_s3 + $0x348] sm:$0xf0]  ;;  %v3375_v60 = vld [vmem:[%s4985_s2 + $0x8] ss:$0 sm:$0xff] }
  0xcb   :  { %vm633_vm6 = vcmp.gt.f32.partialorder %v598_v52, 0.0  ;;  %v642_v63 = vmul.f32 0.01, %v598_v52  ;;  %vm634_vm7 = vcmp.gt.f32.partialorder %v611_v59, 0.0  ;;  %v643_v2 = vmul.f32 0.01, %v611_v59  ;;  %1702 = vmatpush.bf16.msrb.mxu2 %v2748_v45  ;;  %1682 = vmatpush.bf16.msrb.mxu0 %v2572_v55 }
  0xcc   :  { %v2860_v45 = vor.u32 %v3307_v36, %v2857_v38  ;;  %v3269_v54 = vld [vmem:[%s4986_s3 + $0x224] sm:$0xf]  ;;  %v2705_v55 = vld [vmem:[%s4986_s3 + $0x228] sm:$0xf0]  ;;  %v2788_v58 = vor.u32 %v3289_v46, %v2785_v47  ;;  %v3343_v23 = vld [vmem:[%s4986_s3 + $0x474] sm:$0xf] }
  0xcd   :  { %v651_v5 = vsel %vm633_vm6, %v598_v52, %v642_v63  ;;  %v652_v11 = vsel %vm634_vm7, %v611_v59, %v643_v2  ;;  %1690 = vmatpush.bf16.msrb.mxu1 %v2676_v0  ;;  %v3305_v52 = vld [vmem:[%s4986_s3 + $0x344] sm:$0xf]  ;;  %v2708_v62 = vor.u32 %v3269_v54, %v2705_v55  ;;  %v2644_v63 = vor.u32 %v3253_v56, %v2641_v57  ;;  %v2841_v0 = vld [vmem:[%s4986_s3 + $0x338] sm:$0xf0]  ;;  %v2625_v22 = vld [vmem:[%s4986_s3 + $0x188] sm:$0xf0] }
  0xce   :  { %v4539_v10 = vpack.c.bf16 %v651_v5, %v651_v5  ;;  %v4541_v14 = vpack.c.bf16 %v652_v11, %v652_v11  ;;  %1670 = vmatpush.bf16.msra.mxu3 %v2500_v6  ;;  %v2852_v59 = vor.u32 %v3305_v52, %v2849_v53  ;;  %v2697_v2 = vld [vmem:[%s4986_s3 + $0x218] sm:$0xf0]  ;;  %v2780_v5 = vor.u32 %v3287_v61, %v2777_v50  ;;  %v3285_v6 = vld [vmem:[%s4986_s3 + $0x2a4] sm:$0xf]  ;;  %v3299_v34 = vld [vmem:[%s4986_s3 + $0x314] sm:$0xf] }
  0xcf   :  { %1703 = vmatpush.bf16.msrb.mxu2 %v2740_v3  ;;  %1683 = vmatpush.bf16.msrb.mxu0 %v2564_v12  ;;  %v3251_v3 = vld [vmem:[%s4986_s3 + $0x194] sm:$0xf]  ;;  %v3301_v12 = vld [vmem:[%s4986_s3 + $0x324] sm:$0xf]  ;;  %v2700_v18 = vor.u32 %v3267_v1, %v2697_v2  ;;  %v2772_v28 = vor.u32 %v3285_v6, %v2769_v7  ;;  %v3004_v38 = vor.u32 %v3343_v23, %v3001_v24  ;;  %v2817_v53 = vld [vmem:[%s4986_s3 + $0x308] sm:$0xf0] }
  0xd0   :  { %1619 = vmatmul.bf16.vlgmr.msrb.gmra.mxu3 %v4539_v10  ;;  %v599_v25 = vpop.f32.mrf.mxu2  ;;  %1632 = vmatmul.bf16.vlgmr.msra.gmra.mxu0 %v4541_v14  ;;  %v612_v29 = vpop.f32.mrf.mxu3  ;;  %v2636_v19 = vor.u32 %v3251_v3, %v2633_v4  ;;  %v3341_v40 = vld [vmem:[%s4986_s3 + $0x464] sm:$0xf]  ;;  %v3339_v57 = vld [vmem:[%s4986_s3 + $0x454] sm:$0xf]  ;;  %v2921_v61 = vld [vmem:[%s4986_s3 + $0x3d8] sm:$0xf0] }
  0xd1   :  { %1691 = vmatpush.bf16.msrb.mxu1 %v2668_v17  ;;  %v3327_v25 = vld [vmem:[%s4986_s3 + $0x3f4] sm:$0xf]  ;;  %v3297_v52 = vld [vmem:[%s4986_s3 + $0x304] sm:$0xf]  ;;  %v2996_v54 = vor.u32 %v3341_v40, %v2993_v41  ;;  %v2969_v4 = vld [vmem:[%s4986_s3 + $0x438] sm:$0xf0] }
  0xd2   :  { %1715 = vmatpush.bf16.msrb.mxu3 %v2812_v13  ;;  %v2833_v13 = vld [vmem:[%s4986_s3 + $0x328] sm:$0xf0]  ;;  %v3283_v29 = vld [vmem:[%s4986_s3 + $0x294] sm:$0xf]  ;;  %v3333_v7 = vld [vmem:[%s4986_s3 + $0x424] sm:$0xf] }
  0xd3   :  { %1728 = vmatpush.bf16.msra.mxu0 %v2876_v16  ;;  %1704 = vmatpush.bf16.msrb.mxu2 %v2732_v21  ;;  %v3265_v16 = vld [vmem:[%s4986_s3 + $0x204] sm:$0xf]  ;;  %v3335_v3 = vld [vmem:[%s4986_s3 + $0x434] sm:$0xf]  ;;  %v2945_v23 = vld [vmem:[%s4986_s3 + $0x408] sm:$0xf0] }
  0xd4   :  { %v3249_v21 = vld [vmem:[%s4986_s3 + $0x184] sm:$0xf] }
  0xd5   :  { %1692 = vmatpush.bf16.msrb.mxu1 %v2660_v32  ;;  %v2692_v32 = vor.u32 %v3265_v16, %v2689_v20  ;;  %v2628_v33 = vor.u32 %v3249_v21, %v2625_v22  ;;  %v3329_v22 = vld [vmem:[%s4986_s3 + $0x404] sm:$0xf] }
  0xd6   :  { %1716 = vmatpush.bf16.msrb.mxu3 %v2804_v30  ;;  %v2761_v30 = vld [vmem:[%s4986_s3 + $0x298] sm:$0xf0]  ;;  %v3313_v24 = vld [vmem:[%s4986_s3 + $0x384] sm:$0xf] }
  0xd7   :  { %1729 = vmatpush.bf16.msra.mxu0 %v2868_v31  ;;  %1705 = vmatpush.bf16.msrb.mxu2 %v2724_v35  ;;  %v2825_v35 = vld [vmem:[%s4986_s3 + $0x318] sm:$0xf0]  ;;  %v2764_v27 = vor.u32 %v3283_v29, %v2761_v30  ;;  %v3360_v29 = vld [vmem:[%s4987_s5 + $0x74] sm:$0xf0]  ;;  %v3359_v30 = vld [vmem:[%s4987_s5 + $0x74] sm:$0xf] }
  0xd8   :  { %v2828_v47 = vor.u32 %v3299_v34, %v2825_v35  ;;  %v3358_v34 = vld [vmem:[%s4987_s5 + $0x64] sm:$0xf0]  ;;  %v3357_v35 = vld [vmem:[%s4987_s5 + $0x64] sm:$0xf] }
  0xd9   :  { %1658 = vmatmul.bf16.vlgmr.msra.gmra.mxu2 %v4289_v44  ;;  %1693 = vmatpush.bf16.msrb.mxu1 %v2652_v51  ;;  %v3303_v44 = vld [vmem:[%s4986_s3 + $0x334] sm:$0xf]  ;;  %v2753_v51 = vld [vmem:[%s4986_s3 + $0x288] sm:$0xf0] }
  0xda   :  { %1717 = vmatpush.bf16.msrb.mxu3 %v2796_v43  ;;  %v2844_v11 = vor.u32 %v3303_v44, %v2841_v0  ;;  %v3325_v43 = vld [vmem:[%s4986_s3 + $0x3e4] sm:$0xf]  ;;  %v2913_v0 = vld [vmem:[%s4986_s3 + $0x3c8] sm:$0xf0] }
  0xdb   :  { %1730 = vmatpush.bf16.msra.mxu0 %v2860_v45  ;;  %1706 = vmatpush.bf16.msrb.mxu2 %v2716_v48  ;;  %v2929_v45 = vld [vmem:[%s4986_s3 + $0x3e8] sm:$0xf0]  ;;  %v3281_v48 = vld [vmem:[%s4986_s3 + $0x284] sm:$0xf] }
  0xdc   :  { %v2932_v55 = vor.u32 %v3325_v43, %v2929_v45  ;;  %v2756_v56 = vor.u32 %v3281_v48, %v2753_v51  ;;  %v3321_v44 = vld [vmem:[%s4986_s3 + $0x3c4] sm:$0xf]  ;;  %v3047_v43 = vld [vmem:[%s4987_s5 + $0x50] sm:$0xf]  ;;  %v3356_v45 = vld [vmem:[%s4987_s5 + $0x54] sm:$0xf0] }
  0xdd   :  { %1694 = vmatpush.bf16.msrb.mxu1 %v2644_v63  ;;  %v3337_v63 = vld [vmem:[%s4986_s3 + $0x444] sm:$0xf]  ;;  %v2916_v2 = vor.u32 %v3321_v44, %v2913_v0  ;;  %v3049_v48 = vld [vmem:[%s4987_s5 + $0x58] sm:$0xf0] }
  0xde   :  { %1718 = vmatpush.bf16.msrb.mxu3 %v2788_v58  ;;  %v2985_v58 = vld [vmem:[%s4986_s3 + $0x458] sm:$0xf0] }
  0xdf   :  { %1731 = vmatpush.bf16.msra.mxu0 %v2852_v59  ;;  %1707 = vmatpush.bf16.msrb.mxu2 %v2708_v62  ;;  %v2820_v59 = vor.u32 %v3297_v52, %v2817_v53  ;;  %v2988_v50 = vor.u32 %v3339_v57, %v2985_v58  ;;  %v3039_v53 = vld [vmem:[%s4987_s5 + $0x40] sm:$0xf]  ;;  %v3041_v57 = vld [vmem:[%s4987_s5 + $0x48] sm:$0xf0] }
  0xe0   :  { %v623_v9 = vpop.f32.mrf.mxu0  ;;  %1671 = vmatmul.bf16.vlgmr.msra.gmra.mxu3 %v4297_v49  ;;  %1684 = vmatmul.bf16.vlgmr.msrb.gmra.mxu0 %v4331_v8  ;;  %v2937_v49 = vld [vmem:[%s4986_s3 + $0x3f8] sm:$0xf0]  ;;  %v2836_v8 = vor.u32 %v3301_v12, %v2833_v13  ;;  %v2897_v12 = vld [vmem:[%s4986_s3 + $0x3a8] sm:$0xf0] }
  0xe1   :  { %v624_v17 = vadd.f32 %v3375_v60, %v623_v9  ;;  %1695 = vmatpush.bf16.msrb.mxu1 %v2636_v19  ;;  %v2940_v39 = vor.u32 %v3327_v25, %v2937_v49  ;;  %v3323_v60 = vld [vmem:[%s4986_s3 + $0x3d4] sm:$0xf]  ;;  %v2961_v9 = vld [vmem:[%s4986_s3 + $0x428] sm:$0xf0]  ;;  %v2889_v19 = vld [vmem:[%s4986_s3 + $0x398] sm:$0xf0] }
  0xe2   :  { %1719 = vmatpush.bf16.msrb.mxu3 %v2780_v5  ;;  %v2924_v62 = vor.u32 %v3323_v60, %v2921_v61  ;;  %v3319_v5 = vld [vmem:[%s4986_s3 + $0x3b4] sm:$0xf]  ;;  %v2964_v13 = vor.u32 %v3333_v7, %v2961_v9  ;;  %v2881_v25 = vld [vmem:[%s4986_s3 + $0x388] sm:$0xf0]  ;;  %v3031_v61 = vld [vmem:[%s4987_s5 + $0x30] sm:$0xf] }
  0xe3   :  { %vm635_vm8 = vcmp.gt.f32.partialorder %v624_v17, 0.0  ;;  %v644_v26 = vmul.f32 0.01, %v624_v17  ;;  %1732 = vmatpush.bf16.msra.mxu0 %v2844_v11  ;;  %1708 = vmatpush.bf16.msrb.mxu2 %v2700_v18  ;;  %v3317_v11 = vld [vmem:[%s4986_s3 + $0x3a4] sm:$0xf] }
  0xe4   :  { %v2900_v16 = vor.u32 %v3317_v11, %v2897_v12  ;;  %v3315_v18 = vld [vmem:[%s4986_s3 + $0x394] sm:$0xf]  ;;  %v3017_v11 = vld [vmem:[%s4987_s5 + $0x18] sm:$0xf0] }
  0xe5   :  { %v653_v31 = vsel %vm635_vm8, %v624_v17, %v644_v26  ;;  %1696 = vmatpush.bf16.msrb.mxu1 %v2628_v33  ;;  %v3331_v17 = vld [vmem:[%s4986_s3 + $0x414] sm:$0xf]  ;;  %v2892_v21 = vor.u32 %v3315_v18, %v2889_v19  ;;  %v2948_v26 = vor.u32 %v3329_v22, %v2945_v23  ;;  %v3055_v33 = vld [vmem:[%s4987_s5 + $0x60] sm:$0xf]  ;;  %v3009_v19 = vld [vmem:[%s4987_s5 + $0x8] sm:$0xf0] }
  0xe6   :  { %v4695_v36 = vpack.c.bf16 %v653_v31, %v653_v31  ;;  %1720 = vmatpush.bf16.msrb.mxu3 %v2772_v28  ;;  %v2884_v28 = vor.u32 %v3313_v24, %v2881_v25  ;;  %v3347_v7 = vld [vmem:[%s4987_s5 + $0x14] sm:$0xf] }
  0xe7   :  { %1733 = vmatpush.bf16.msra.mxu0 %v2836_v8  ;;  %1709 = vmatpush.bf16.msrb.mxu2 %v2692_v32  ;;  %v3063_v8 = vld [vmem:[%s4987_s5 + $0x70] sm:$0xf]  ;;  %v3065_v32 = vld [vmem:[%s4987_s5 + $0x78] sm:$0xf0] }
  0xe8   :  { %v625_v46 = vpop.f32.mrf.mxu0  ;;  %1645 = vmatmul.bf16.vlgmr.msra.gmra.mxu1 %v4695_v36  ;;  %v3064_v31 = vor.u32 %v3360_v29, %v3063_v8 }
  0xe9   :  { %1741 = vmatpush.bf16.msra.mxu1 %v2940_v39  ;;  %v3057_v39 = vld [vmem:[%s4987_s5 + $0x68] sm:$0xf0]  ;;  %v3355_v46 = vld [vmem:[%s4987_s5 + $0x54] sm:$0xf] }
  0xea   :  { %1721 = vmatpush.bf16.msrb.mxu3 %v2764_v27  ;;  %1710 = vmatmul.bf16.vlgmr.msrb.gmra.mxu2 %v4485_v37  ;;  %v2977_v37 = vld [vmem:[%s4986_s3 + $0x448] sm:$0xf0]  ;;  %v3060_v41 = vor.u32 %v3357_v35, %v3057_v39  ;;  %v3052_v52 = vor.u32 %v3355_v46, %v3049_v48 }
  0xeb   :  { %1754 = vmatpush.bf16.msra.mxu2 %v3004_v38  ;;  %1734 = vmatpush.bf16.msra.mxu0 %v2828_v47  ;;  %v2980_v1 = vor.u32 %v3337_v63, %v2977_v37  ;;  %v3056_v38 = vor.u32 %v3358_v34, %v3055_v33  ;;  %v3048_v47 = vor.u32 %v3356_v45, %v3047_v43  ;;  %v3033_v37 = vld [vmem:[%s4987_s5 + $0x38] sm:$0xf0]  ;;  %v1793_v34 = vld [vmem:[%s4987_s5 + $0x90] sm:$0x77] }
  0xec   :  { %v1856_v39 = vunpack.c.h.b16 %v1793_v34 }
  0xed   :  { %1742 = vmatpush.bf16.msra.mxu1 %v2932_v55  ;;  %v3353_v55 = vld [vmem:[%s4987_s5 + $0x44] sm:$0xf] }
  0xee   :  { %1722 = vmatpush.bf16.msrb.mxu3 %v2756_v56  ;;  %v1876_v43 = vpack.c.b16 %v1856_v39, %v1856_v39 }
  0xef   :  { %1755 = vmatpush.bf16.msra.mxu2 %v2996_v54  ;;  %1735 = vmatpush.bf16.msra.mxu0 %v2820_v59  ;;  %v3354_v54 = vld [vmem:[%s4987_s5 + $0x44] sm:$0xf0]  ;;  %v3044_v59 = vor.u32 %v3353_v55, %v3041_v57 }
  0xf0   :  { %v3040_v56 = vor.u32 %v3354_v54, %v3039_v53  ;;  %v1904_v46 = vsel %vm1899_vm9, %v1876_v43, 0 }
  0xf1   :  { %1723 = vmatmul.bf16.vlgmr.msrb.gmra.mxu3 %v4496_v42  ;;  %1743 = vmatpush.bf16.msra.mxu1 %v2924_v62  ;;  %v2905_v42 = vld [vmem:[%s4986_s3 + $0x3b8] sm:$0xf0]  ;;  %v3351_v62 = vld [vmem:[%s4987_s5 + $0x34] sm:$0xf] }
  0xf2   :  { %1736 = vmatmul.bf16.vlgmr.msra.gmra.mxu0 %v4539_v10  ;;  %v2972_v10 = vor.u32 %v3335_v3, %v2969_v4  ;;  %v2908_v6 = vor.u32 %v3319_v5, %v2905_v42  ;;  %1906 = vmatpush.bf16.msra.mxu3 %v3064_v31  ;;  %v3036_v0 = vor.u32 %v3351_v62, %v3033_v37  ;;  %v3349_v3 = vld [vmem:[%s4987_s5 + $0x24] sm:$0xf]  ;;  %v3025_v5 = vld [vmem:[%s4987_s5 + $0x28] sm:$0xf0] }
  0xf3   :  { %1756 = vmatpush.bf16.msra.mxu2 %v2988_v50  ;;  %v3352_v50 = vld [vmem:[%s4987_s5 + $0x34] sm:$0xf0]  ;;  %v3028_v42 = vor.u32 %v3349_v3, %v3025_v5 }
  0xf4   :  { %v3032_v63 = vor.u32 %v3352_v50, %v3031_v61  ;;  %v3361_v61 = vld [vmem:[%s4987_s5 + $0x84] sm:$0xf] }
  0xf5   :  { %1744 = vmatpush.bf16.msra.mxu1 %v2916_v2  ;;  %v3350_v2 = vld [vmem:[%s4987_s5 + $0x24] sm:$0xf0] }
  0xf6   :  { %1907 = vmatpush.bf16.msra.mxu3 %v3056_v38  ;;  %v1855_v38 = vunpack.c.l.b16 %v1793_v34 }
  0xf7   :  { %1757 = vmatpush.bf16.msra.mxu2 %v2980_v1  ;;  %v3023_v1 = vld [vmem:[%s4987_s5 + $0x20] sm:$0xf] }
  0xf8   :  { %1697 = vmatmul.bf16.vlgmr.msrb.gmra.mxu1 %v4342_v15  ;;  %v2953_v15 = vld [vmem:[%s4986_s3 + $0x418] sm:$0xf0]  ;;  %v3024_v4 = vor.u32 %v3350_v2, %v3023_v1 }
  0xf9   :  { %1745 = vmatpush.bf16.msra.mxu1 %v2908_v6  ;;  %v2956_v20 = vor.u32 %v3331_v17, %v2953_v15  ;;  %v3348_v6 = vld [vmem:[%s4987_s5 + $0x14] sm:$0xf0]  ;;  %v3346_v17 = vld [vmem:[%s4987_s5 + $0x4] sm:$0xf0]  ;;  %v3345_v15 = vld [vmem:[%s4987_s5 + $0x4] sm:$0xf] }
  0xfa   :  { %1908 = vmatpush.bf16.msra.mxu3 %v3048_v47 }
  0xfb   :  { %1758 = vmatpush.bf16.msra.mxu2 %v2972_v10  ;;  %v3015_v10 = vld [vmem:[%s4987_s5 + $0x10] sm:$0xf] }
  0xfc   :  { %v3016_v9 = vor.u32 %v3348_v6, %v3015_v10 }
  0xfd   :  { %1746 = vmatpush.bf16.msra.mxu1 %v2900_v16  ;;  %v3007_v16 = vld [vmem:[%s4987_s5] sm:$0xf] }
  0xfe   :  { %1909 = vmatpush.bf16.msra.mxu3 %v3040_v56  ;;  %v3008_v18 = vor.u32 %v3346_v17, %v3007_v16 }
  0xff   :  { %1759 = vmatpush.bf16.msra.mxu2 %v2964_v13  ;;  %v3020_v13 = vor.u32 %v3347_v7, %v3017_v11 }
 0x101   :  { %1747 = vmatpush.bf16.msra.mxu1 %v2892_v21  ;;  %v3012_v21 = vor.u32 %v3345_v15, %v3009_v19 }
 0x102   :  { %1910 = vmatpush.bf16.msra.mxu3 %v3032_v63  ;;  %v3073_v63 = vld [vmem:[%s4987_s5 + $0x88] sm:$0xf0] }
 0x103   :  { %1760 = vmatpush.bf16.msra.mxu2 %v2956_v20  ;;  %v807_v20 = vld [vmem:[%s4988_s4] sm:$0x3] }
 0x104   :  { %v809_v22 = vperm.slane %v807_v20, 0 }
 0x105   :  { %1748 = vmatpush.bf16.msra.mxu1 %v2884_v28 }
 0x106   :  { %1911 = vmatpush.bf16.msra.mxu3 %v3024_v4 }
 0x107   :  { %1761 = vmatpush.bf16.msra.mxu2 %v2948_v26 }
 0x108   :  { %1749 = vmatmul.bf16.vlgmr.msra.gmra.mxu1 %v4541_v14  ;;  %v3068_v14 = vor.u32 %v3359_v30, %v3065_v32 }
 0x10a   :  { %1762 = vmatmul.bf16.vlgmr.msra.gmra.mxu2 %v4695_v36  ;;  %1932 = vmatpush.bf16.msrb.mxu1 %v3068_v14 }
 0x10b   :  { %1912 = vmatpush.bf16.msra.mxu3 %v3016_v9  ;;  %1951 = vmatpush.bf16.msrb.mxu2 %v1904_v46  ;;  %v3374_v46 = vld [vmem:[%s4991_s9 + $0x10] sm:$0xff] }
 0x10e   :  { %1933 = vmatpush.bf16.msrb.mxu1 %v3060_v41 }
 0x10f   :  { %1913 = vmatpush.bf16.msra.mxu3 %v3008_v18 }
 0x112   :  { %1934 = vmatpush.bf16.msrb.mxu1 %v3052_v52 }
 0x116   :  { %1935 = vmatpush.bf16.msrb.mxu1 %v3044_v59  ;;  %v3071_v59 = vld [vmem:[%s4987_s5 + $0x80] sm:$0xf] }
 0x11a   :  { %1936 = vmatpush.bf16.msrb.mxu1 %v3036_v0  ;;  %v810_v0 = vperm.slane %v807_v20, 1 }
 0x11e   :  { %1937 = vmatpush.bf16.msrb.mxu1 %v3028_v42 }
 0x122   :  { %1938 = vmatpush.bf16.msrb.mxu1 %v3020_v13 }
 0x125   :  { %v4800_v49 = vpop.f32.mrf.mxu1 }
 0x126   :  { %1939 = vmatpush.bf16.msrb.mxu1 %v3012_v21  ;;  %v1543_v26 = vadd.f32 %v4800_v49, %v809_v22 }
 0x12c   :  { %v4823_v36 = vpop.f32.mrf.mxu2 }
 0x12d   :  { %v1544_v40 = vpop.f32.mrf.mxu1  ;;  %v1556_v28 = vadd.f32 %v4823_v36, %v1543_v26  ;;  %v1875_v36 = vpack.c.b16 %v1855_v38, %v1855_v38  ;;  %v3368_v26 = vld [vmem:[%s4990_s7 + $0x28] sm:$0xff] }
 0x12f   :  { %v4828_v27 = vpop.f32.mrf.mxu0  ;;  %v1901_v45 = vsel %vm1899_vm9, %v1875_v36, 0 }
 0x130   :  { %1925 = vmatpush.bf16.msrb.mxu0 %v1901_v45 }
 0x134   :  { %v1568_v51 = vpop.f32.mrf.mxu3  ;;  %v1557_v58 = vpop.f32.mrf.mxu2 }
 0x135   :  { %v1569_v29 = vadd.f32 %v1568_v51, %v1556_v28  ;;  %v3367_v28 = vld [vmem:[%s4990_s7 + $0x20] sm:$0xff] }
 0x137   :  { %v1583_v60 = vpop.f32.mrf.mxu0  ;;  %v1582_v32 = vadd.f32 %v4828_v27, %v1569_v29 }
 0x138   :  { %v3362_v60 = vld [vmem:[%s4987_s5 + $0x84] sm:$0xf0] }
 0x139   :  { %v3072_v62 = vor.u32 %v3362_v60, %v3071_v59 }
 0x13b   :  { %1926 = vmatpush.bf16.msrb.mxu0 %v3072_v62 }
 0x13c   :  { %v1570_v44 = vpop.f32.mrf.mxu3 }
 0x13d   :  { %v3076_v44 = vor.u32 %v3361_v61, %v3073_v63 }
 0x13f   :  { %1952 = vmatpush.bf16.msrb.mxu2 %v3076_v44  ;;  %v3372_v44 = vld [vmem:[%s4991_s9] sm:$0xff] }
 0x145   :  { %v1594_v12 = vpop.f32.mrf.mxu1 }
 0x146   :  { %v1595_v14 = vadd.f32 %v1594_v12, %v1582_v32  ;;  %v3364_v32 = vld [vmem:[%s4990_s7 + $0x8] sm:$0xff] }
 0x14c   :  { %v1607_v23 = vpop.f32.mrf.mxu2 }
 0x14d   :  { %v1633_v24 = vpop.f32.mrf.mxu0  ;;  %v1596_v25 = vpop.f32.mrf.mxu1  ;;  %v1608_v35 = vadd.f32 %v1607_v23, %v1595_v14 }
 0x14e   :  { %v3369_v25 = vld [vmem:[%s4990_s7 + $0x30] sm:$0xff] }
 0x153   :  { %v1620_v8 = vpop.f32.mrf.mxu3 }
 0x154   :  { %v1609_v30 = vpop.f32.mrf.mxu2  ;;  %v1621_v49 = vadd.f32 %v1620_v8, %v1608_v35  ;;  %v3366_v8 = vld [vmem:[%s4990_s7 + $0x18] sm:$0xff]  ;;  %v3363_v35 = vld [vmem:[%s4990_s7] sm:$0xff] }
 0x155   :  { %v1635_v31 = vpop.f32.mrf.mxu0  ;;  %v3365_v30 = vld [vmem:[%s4990_s7 + $0x10] sm:$0xff] }
 0x156   :  { %v1634_v27 = vadd.f32 %v1633_v24, %v1621_v49  ;;  %v3370_v24 = vld [vmem:[%s4990_s7 + $0x38] sm:$0xff] }
 0x157   :  { %2052 = vmatpush.bf16.msrb.mxu3 %v3370_v24  ;;  %v2088_v49 = vld [vmem:[%s4991_s9 + $0x18] sm:$0x1] }
 0x158   :  { %v2106_v36 = vunpack.c.l.b16 %v2088_v49 }
 0x15a   :  { %v2110_v43 = vpack.c.b16 %v2106_v36, %v2106_v36 }
 0x15b   :  { %v1622_v33 = vpop.f32.mrf.mxu3  ;;  %2053 = vmatpush.bf16.msrb.mxu3 %v3369_v25 }
 0x15c   :  { %v1659_v40 = vpop.f32.mrf.mxu2  ;;  %v1984_v33 = vld [vmem:[%s4990_s7 + $0x48] sm:$0x7]  ;;  %v2120_v45 = vsel %vm2118_vm13, %v2110_v43, 0 }
 0x15d   :  { %v1685_v41 = vpop.f32.mrf.mxu0  ;;  %v1660_v1 = vadd.f32 %v1659_v40, %v810_v0  ;;  %v2026_v34 = vunpack.c.l.b16 %v1984_v33  ;;  %2126 = vmatpush.bf16.msra.mxu2 %v2120_v45  ;;  %v3376_v0 = vld [vmem:[%s4989_s8] ss:$0 sm:$0xff] }
 0x15f   :  { %2054 = vmatpush.bf16.msrb.mxu3 %v3368_v26  ;;  %v2036_v38 = vpack.c.b16 %v2026_v34, %v2026_v34 }
 0x161   :  { %v2050_v39 = vsel %vm1899_vm9, %v2036_v38, 0  ;;  %2127 = vmatpush.bf16.msra.mxu2 %v3374_v46 }
 0x162   :  { %2071 = vmatpush.bf16.msra.mxu0 %v2050_v39 }
 0x163   :  { %v1672_v47 = vpop.f32.mrf.mxu3  ;;  %2055 = vmatpush.bf16.msrb.mxu3 %v3367_v28 }
 0x164   :  { %v1661_v52 = vpop.f32.mrf.mxu2  ;;  %v1673_v4 = vadd.f32 %v1672_v47, %v1660_v1 }
 0x165   :  { %v1646_v48 = vpop.f32.mrf.mxu1  ;;  %v1687_v53 = vpop.f32.mrf.mxu0 }
 0x166   :  { %v1647_v51 = vadd.f32 %v1646_v48, %v1634_v27  ;;  %v1686_v10 = vadd.f32 %v1685_v41, %v1673_v4  ;;  %v3371_v41 = vld [vmem:[%s4990_s7 + $0x40] sm:$0xff] }
 0x167   :  { %2056 = vmatpush.bf16.msrb.mxu3 %v3366_v8  ;;  %2072 = vmatpush.bf16.msra.mxu0 %v3371_v41  ;;  %v1794_v27 = vld [vmem:[%s4992_s6] sm:$0x3] }
 0x168   :  { %vm1767_vm10 = vcmp.gt.f32.partialorder %v1647_v51, 0.0  ;;  %v1769_v54 = vmul.f32 0.01, %v1647_v51  ;;  %v1796_v47 = vperm.slane %v1794_v27, 0  ;;  %v1797_v52 = vperm.slane %v1794_v27, 1 }
 0x16a   :  { %v1771_v55 = vsel %vm1767_vm10, %v1647_v51, %v1769_v54 }
 0x16b   :  { %v1773_v56 = vpack.c.bf16 %v1771_v55, %v1771_v55  ;;  %v1674_v57 = vpop.f32.mrf.mxu3  ;;  %2057 = vmatpush.bf16.msrb.mxu3 %v3365_v30 }
 0x16d   :  { %v1648_v58 = vpop.f32.mrf.mxu1  ;;  %1914 = vmatmul.bf16.vlgmr.msra.gmra.mxu3 %v1773_v56  ;;  %1940 = vmatmul.bf16.vlgmr.msrb.gmra.mxu1 %v1773_v56  ;;  %v1711_v50 = vpop.f32.mrf.mxu2 }
 0x16f   :  { %v1737_v37 = vpop.f32.mrf.mxu0  ;;  %2058 = vmatpush.bf16.msrb.mxu3 %v3364_v32 }
 0x173   :  { %2059 = vmatpush.bf16.msrb.mxu3 %v3363_v35 }
 0x174   :  { %v1724_v2 = vpop.f32.mrf.mxu3 }
 0x175   :  { %v1698_v3 = vpop.f32.mrf.mxu1  ;;  %v1713_v5 = vpop.f32.mrf.mxu2 }
 0x176   :  { %v1699_v6 = vadd.f32 %v1698_v3, %v1686_v10 }
 0x177   :  { %v1739_v42 = vpop.f32.mrf.mxu0 }
 0x178   :  { %v1712_v11 = vadd.f32 %v1711_v50, %v1699_v6 }
 0x17a   :  { %v1725_v12 = vadd.f32 %v1724_v2, %v1712_v11 }
 0x17c   :  { %v1726_v7 = vpop.f32.mrf.mxu3  ;;  %v1738_v16 = vadd.f32 %v1737_v37, %v1725_v12  ;;  %v3373_v37 = vld [vmem:[%s4991_s9 + $0x8] sm:$0xff] }
 0x17d   :  { %v1700_v9 = vpop.f32.mrf.mxu1  ;;  %2128 = vmatpush.bf16.msra.mxu2 %v3373_v37 }
 0x17e   :  { %v3377_v9 = vld [vmem:[%s4993_s10] ss:$0 sm:$0xff] }
 0x181   :  { %2129 = vmatpush.bf16.msra.mxu2 %v3372_v44 }
 0x185   :  { %v1750_v13 = vpop.f32.mrf.mxu1 }
 0x186   :  { %v1751_v17 = vadd.f32 %v1750_v13, %v1738_v16 }
 0x18d   :  { %v1763_v15 = vpop.f32.mrf.mxu2  ;;  %v1752_v20 = vpop.f32.mrf.mxu1 }
 0x18e   :  { %v1764_v18 = vadd.f32 %v1763_v15, %v1751_v17 }
 0x190   :  { %vm1768_vm11 = vcmp.gt.f32.partialorder %v1764_v18, 0.0  ;;  %v1770_v19 = vmul.f32 0.01, %v1764_v18 }
 0x192   :  { %v1772_v21 = vsel %vm1768_vm11, %v1764_v18, %v1770_v19 }
 0x193   :  { %v1774_v22 = vpack.c.bf16 %v1772_v21, %v1772_v21 }
 0x195   :  { %v1765_v23 = vpop.f32.mrf.mxu2  ;;  %3077 = vmatmul.msk.bf16.vlgmr.msrb.gmra.mxu0 %vm1895_vm12, %v1774_v22  ;;  %3078 = vmatmul.msk.bf16.vlgmr.msrb.gmra.mxu2 %vm1895_vm12, %v1774_v22 }
 0x1ea   :  { %v1941_v29 = vpop.f32.mrf.mxu1 }
 0x1eb   :  { %v1942_v55 = vadd.f32 %v1941_v29, %v1797_v52 }
 0x1f0   :  { %v1915_v31 = vpop.f32.mrf.mxu3 }
 0x1f1   :  { %v1916_v48 = vadd.f32 %v1915_v31, %v1796_v47 }
 0x1f2   :  { %v1943_v14 = vpop.f32.mrf.mxu1 }
 0x1f8   :  { %v1917_v40 = vpop.f32.mrf.mxu3 }
 0x212   :  { %v1928_v51 = vpop.f32.mrf.mxu0 }
 0x213   :  { %v1929_v53 = vadd.f32 %v1928_v51, %v1916_v48 }
 0x215   :  { %vm1958_vm14 = vcmp.gt.f32.partialorder %v1929_v53, 0.0  ;;  %v1960_v54 = vmul.f32 0.01, %v1929_v53 }
 0x217   :  { %v1962_v56 = vsel %vm1958_vm14, %v1929_v53, %v1960_v54 }
 0x218   :  { %v1964_v57 = vpack.c.bf16 %v1962_v56, %v1962_v56  ;;  %v1954_v58 = vpop.f32.mrf.mxu2 }
 0x219   :  { %v1955_v59 = vadd.f32 %v1954_v58, %v1942_v55 }
 0x21a   :  { %v1930_v60 = vpop.f32.mrf.mxu0  ;;  %2060 = vmatmul.bf16.vlgmr.msrb.gmra.mxu3 %v1964_v57 }
 0x21b   :  { %vm1959_vm15 = vcmp.gt.f32.partialorder %v1955_v59, 0.0  ;;  %v1961_v61 = vmul.f32 0.01, %v1955_v59 }
 0x21d   :  { %v1963_v50 = vsel %vm1959_vm15, %v1955_v59, %v1961_v61 }
 0x21e   :  { %v1965_v62 = vpack.c.bf16 %v1963_v50, %v1963_v50 }
 0x220   :  { %v1956_v63 = vpop.f32.mrf.mxu2  ;;  %3115 = vmatmul.msk.bf16.vlgmr.msra.gmra.mxu0 %vm1895_vm12, %v1965_v62 }
 0x29d   :  { %v2061_v1 = vpop.f32.mrf.mxu3  ;;  %v2074_v2 = vpop.f32.mrf.mxu0 }
 0x29e   :  { %v2062_v3 = vadd.f32 %v3376_v0, %v2061_v1 }
 0x2a0   :  { %v2075_v4 = vadd.f32 %v2074_v2, %v2062_v3 }
 0x2a2   :  { %vm2078_vm0 = vcmp.gt.f32.partialorder %v2075_v4, 0.0  ;;  %v2079_v5 = vmul.f32 0.01, %v2075_v4 }
 0x2a4   :  { %v2080_v42 = vsel %vm2078_vm0, %v2075_v4, %v2079_v5 }
 0x2a5   :  { %v2081_v10 = vpack.c.bf16 %v2080_v42, %v2080_v42  ;;  %v2063_v6 = vpop.f32.mrf.mxu3  ;;  %v2076_v7 = vpop.f32.mrf.mxu0 }
 0x2a7   :  { %3128 = vmatmul.msk.bf16.vlgmr.msra.gmra.mxu2 %vm2114_vm1, %v2081_v10 }
 0x32a   :  { %v2131_v11 = vpop.f32.mrf.mxu2 }
 0x32b   :  { %v2132_v12 = vadd.f32 %v3377_v9, %v2131_v11 }
 0x32d   :  { %2136 = vst.msk [vmem:[%s4994_s11] sm:$0xff] %vm2135_vm2, %v2132_v12 }
 0x332   :  { %v2133_v13 = vpop.f32.mrf.mxu2 }

</bundles_post_ra>
